<compile_context>
chip_gen: v7x
topology: tpu7x:2x2x1
jax: 0.10.0
libtpu: 0.0.40
codegen_flags: <defaults>
</compile_context>

<pallas_src>
import jax
import jax.numpy as jnp
from jax.experimental import pallas as pl
from jax.experimental.pallas import tpu as pltpu

IN_FEATURES = 784
HIDDEN = 1200
HIDDEN_PAD = 1280   # 1200 rounded up to a multiple of 128 lanes
OUT_FEATURES = 10
B_TILE_MAX = 256


def _net_kernel(x_ref, w1_ref, b1_ref, w2_ref, b2_ref, out_ref):
    # fc1: (bt, 784)[bf16] @ (784, 1280)[bf16] -> f32 accumulation, + bias, ReLU
    h = jnp.dot(x_ref[...], w1_ref[...], preferred_element_type=jnp.float32)
    h = jnp.maximum(h + b1_ref[...], 0.0)

    # fc2: (bt, 1280)[f32] @ (1280, 10)[f32] + bias  (tiny; kept f32)
    logits = jnp.dot(h, w2_ref[...], preferred_element_type=jnp.float32) + b2_ref[...]

    # log_softmax along dim=1 (numerically stable)
    m = jnp.max(logits, axis=-1, keepdims=True)
    shifted = logits - m
    lse = jnp.log(jnp.sum(jnp.exp(shifted), axis=-1, keepdims=True))
    out_ref[...] = (shifted - lse).astype(out_ref.dtype)


def _round_up(n, m):
    return ((n + m - 1) // m) * m


@jax.jit
def net_forward(x_nchw, w1, b1, w2, b2):
    """Fused MLP forward in a single batch-tiled Pallas kernel.

    x_nchw: (B, 1, 28, 28) float32
    w1: (784, 1200), b1: (1, 1200), w2: (1200, 10), b2: (1, 10)   (posterior means, f32)
    returns: (B, 10) float32 log-probabilities
    """
    B = x_nchw.shape[0]
    x = x_nchw.reshape(B, -1)  # same as torch's x.view(x.size(0), -1)

    # bf16 for the bandwidth-dominant operands; zero-pad hidden dim to 1280.
    x_bf = x.astype(jnp.bfloat16)
    w1_p = jnp.pad(w1.astype(jnp.bfloat16), ((0, 0), (0, HIDDEN_PAD - HIDDEN)))
    b1_p = jnp.pad(b1, ((0, 0), (0, HIDDEN_PAD - HIDDEN)))
    w2_p = jnp.pad(w2, ((0, HIDDEN_PAD - HIDDEN), (0, 0)))

    # Coarse batch tiling: one tile per grid step, tile a multiple of 8 sublanes.
    b_tile = min(_round_up(B, 8), B_TILE_MAX)
    padded_B = _round_up(B, b_tile)
    if padded_B != B:
        x_bf = jnp.pad(x_bf, ((0, padded_B - B), (0, 0)))

    grid = (padded_B // b_tile,)
    out = pl.pallas_call(
        _net_kernel,
        out_shape=jax.ShapeDtypeStruct((padded_B, OUT_FEATURES), jnp.float32),
        grid=grid,
        in_specs=[
            pl.BlockSpec((b_tile, IN_FEATURES), lambda i: (i, 0)),          # x tile
            pl.BlockSpec((IN_FEATURES, HIDDEN_PAD), lambda i: (0, 0)),      # w1 (VMEM-resident)
            pl.BlockSpec((1, HIDDEN_PAD), lambda i: (0, 0)),                # b1
            pl.BlockSpec((HIDDEN_PAD, OUT_FEATURES), lambda i: (0, 0)),     # w2
            pl.BlockSpec((1, OUT_FEATURES), lambda i: (0, 0)),              # b2
        ],
        out_specs=pl.BlockSpec((b_tile, OUT_FEATURES), lambda i: (i, 0)),
        compiler_params=pltpu.CompilerParams(
            dimension_semantics=("parallel",),   # engage both TCs on v7x; harmless on v5e/v6e
            vmem_limit_bytes=24 << 20,
        ),
    )(x_bf, w1_p, b1_p, w2_p, b2)
    return out[:B]


def _reference_forward(x_nchw, w1, b1, w2, b2):
    """Pure-JAX reference (same bf16 rounding of x/w1 as the kernel, f32 math otherwise)."""
    B = x_nchw.shape[0]
    x = x_nchw.reshape(B, -1).astype(jnp.bfloat16).astype(jnp.float32)
    w1f = w1.astype(jnp.bfloat16).astype(jnp.float32)
    h = jnp.maximum(
        jnp.dot(x, w1f, precision=jax.lax.Precision.HIGHEST) + b1, 0.0)
    logits = jnp.dot(h, w2, precision=jax.lax.Precision.HIGHEST) + b2
    return jax.nn.log_softmax(logits, axis=1)


if __name__ == "__main__":
    key = jax.random.PRNGKey(0)
    k_x, k_w1, k_b1, k_w2, k_b2 = jax.random.split(key, 5)

    B = 8  # small batch
    # MNIST-shaped NCHW input (B, 1, 28, 28) -> flattened to (B, 784) inside the wrapper.
    x = jax.random.normal(k_x, (B, 1, 28, 28), dtype=jnp.float32)

    # Deterministic synthetic "posterior mean" parameters (weight_mu / bias_mu).
    w1 = jax.random.normal(k_w1, (IN_FEATURES, HIDDEN), dtype=jnp.float32) * 0.05
    b1 = jax.random.normal(k_b1, (1, HIDDEN), dtype=jnp.float32) * 0.05
    w2 = jax.random.normal(k_w2, (HIDDEN, OUT_FEATURES), dtype=jnp.float32) * 0.05
    b2 = jax.random.normal(k_b2, (1, OUT_FEATURES), dtype=jnp.float32) * 0.05

    y = jax.block_until_ready(net_forward(x, w1, b1, w2, b2))
    y_ref = _reference_forward(x, w1, b1, w2, b2)

    assert y.shape == (B, OUT_FEATURES), y.shape
    max_abs_diff = float(jnp.max(jnp.abs(y - y_ref)))
    # Tolerance accounts for bf16 operand rounding and default TPU matmul precision.
    assert jnp.allclose(y, y_ref, atol=5e-2, rtol=5e-2), (
        "mismatch vs reference: max abs diff = %s" % max_abs_diff
    )

    print("KERNEL_OK")
</pallas_src>

<mosaic_0001>
module attributes {stable_mosaic.version = 11 : i64} {
  func.func @_net_kernel(%arg0: i32, %arg1: memref<8x784xbf16, #tpu.memory_space<vmem>>, %arg2: memref<784x1280xbf16, #tpu.memory_space<vmem>>, %arg3: memref<1x1280xf32, #tpu.memory_space<vmem>>, %arg4: memref<1280x10xf32, #tpu.memory_space<vmem>>, %arg5: memref<1x10xf32, #tpu.memory_space<vmem>>, %arg6: memref<8x10xf32, #tpu.memory_space<vmem>>) attributes {dimension_semantics = [#tpu.dimension_semantics<parallel>], iteration_bounds = array<i64: 1>, scalar_prefetch = 0 : i64, scratch_operands = 0 : i64, tpu.core_type = #tpu.core_type<tc>, window_params = [{transform_indices = @transform_0, window_bounds = array<i64: 8, 784>}, {pipeline_mode = #tpu.pipeline_mode<synchronous>, transform_indices = @transform_1, window_bounds = array<i64: 784, 1280>}, {pipeline_mode = #tpu.pipeline_mode<synchronous>, transform_indices = @transform_2, window_bounds = array<i64: 1, 1280>}, {pipeline_mode = #tpu.pipeline_mode<synchronous>, transform_indices = @transform_3, window_bounds = array<i64: 1280, 10>}, {pipeline_mode = #tpu.pipeline_mode<synchronous>, transform_indices = @transform_4, window_bounds = array<i64: 1, 10>}, {transform_indices = @transform_5, window_bounds = array<i64: 8, 10>}]} {
    %c0 = arith.constant 0 : index
    %c0_0 = arith.constant 0 : index
    %0 = vector.load %arg1[%c0, %c0_0] : memref<8x784xbf16, #tpu.memory_space<vmem>>, vector<8x784xbf16>
    %c0_1 = arith.constant 0 : index
    %c0_2 = arith.constant 0 : index
    %1 = vector.load %arg2[%c0_1, %c0_2] : memref<784x1280xbf16, #tpu.memory_space<vmem>>, vector<784x1280xbf16>
    %cst = arith.constant dense<0.000000e+00> : vector<8x1280xf32>
    %2 = tpu.matmul %0, %1, %cst {dimension_numbers = #tpu.dot_dimension_numbers<[1], [0], [0], [1], [0, 0, 1, 1], [], []>} : vector<8x784xbf16>, vector<784x1280xbf16>, vector<8x1280xf32> -> vector<8x1280xf32>
    %c0_3 = arith.constant 0 : index
    %c0_4 = arith.constant 0 : index
    %3 = vector.load %arg3[%c0_3, %c0_4] : memref<1x1280xf32, #tpu.memory_space<vmem>>, vector<1x1280xf32>
    %4 = vector.broadcast %3 : vector<1x1280xf32> to vector<8x1280xf32>
    %5 = arith.addf %2, %4 : vector<8x1280xf32>
    %cst_5 = arith.constant 0.000000e+00 : f32
    %6 = vector.broadcast %cst_5 : f32 to vector<8x1280xf32>
    %7 = arith.maximumf %5, %6 : vector<8x1280xf32>
    %c0_6 = arith.constant 0 : index
    %c0_7 = arith.constant 0 : index
    %8 = vector.load %arg4[%c0_6, %c0_7] : memref<1280x10xf32, #tpu.memory_space<vmem>>, vector<1280x10xf32>
    %cst_8 = arith.constant dense<0.000000e+00> : vector<8x10xf32>
    %9 = tpu.matmul %7, %8, %cst_8 {dimension_numbers = #tpu.dot_dimension_numbers<[1], [0], [0], [1], [0, 0, 1, 1], [], []>} : vector<8x1280xf32>, vector<1280x10xf32>, vector<8x10xf32> -> vector<8x10xf32>
    %c0_9 = arith.constant 0 : index
    %c0_10 = arith.constant 0 : index
    %10 = vector.load %arg5[%c0_9, %c0_10] : memref<1x10xf32, #tpu.memory_space<vmem>>, vector<1x10xf32>
    %11 = vector.broadcast %10 : vector<1x10xf32> to vector<8x10xf32>
    %12 = arith.addf %9, %11 : vector<8x10xf32>
    %cst_11 = arith.constant dense<0xFF800000> : vector<8xf32>
    %13 = vector.multi_reduction <maximumf>, %12, %cst_11 [1] : vector<8x10xf32> to vector<8xf32>
    %14 = vector.shape_cast %13 : vector<8xf32> to vector<8x1xf32>
    %15 = vector.broadcast %14 : vector<8x1xf32> to vector<8x10xf32>
    %16 = arith.subf %12, %15 : vector<8x10xf32>
    %17 = math.exp %16 : vector<8x10xf32>
    %cst_12 = arith.constant dense<0.000000e+00> : vector<8xf32>
    %18 = vector.multi_reduction <add>, %17, %cst_12 [1] : vector<8x10xf32> to vector<8xf32>
    %19 = vector.shape_cast %18 : vector<8xf32> to vector<8x1xf32>
    %20 = math.log %19 : vector<8x1xf32>
    %21 = vector.broadcast %20 : vector<8x1xf32> to vector<8x10xf32>
    %22 = arith.subf %16, %21 : vector<8x10xf32>
    %c0_13 = arith.constant 0 : index
    %c0_14 = arith.constant 0 : index
    %23 = vector.load %arg6[%c0_13, %c0_14] : memref<8x10xf32, #tpu.memory_space<vmem>>, vector<8x10xf32>
    tpu.vector_store %arg6[%c0_13, %c0_14], %22 {strides = array<i32>} : memref<8x10xf32, #tpu.memory_space<vmem>>, vector<8x10xf32>,
    return
  }
  func.func @transform_0(%arg0: i32) -> (i32, i32) {
    %c0_i32 = arith.constant 0 : i32
    %c0_i32_0 = arith.constant 0 : i32
    return %arg0, %c0_i32 : i32, i32
  }
  func.func @transform_1(%arg0: i32) -> (i32, i32) {
    %c0_i32 = arith.constant 0 : i32
    %c0_i32_0 = arith.constant 0 : i32
    %c0_i32_1 = arith.constant 0 : i32
    return %c0_i32, %c0_i32_0 : i32, i32
  }
  func.func @transform_2(%arg0: i32) -> (i32, i32) {
    %c0_i32 = arith.constant 0 : i32
    %c0_i32_0 = arith.constant 0 : i32
    %c0_i32_1 = arith.constant 0 : i32
    return %c0_i32, %c0_i32_0 : i32, i32
  }
  func.func @transform_3(%arg0: i32) -> (i32, i32) {
    %c0_i32 = arith.constant 0 : i32
    %c0_i32_0 = arith.constant 0 : i32
    %c0_i32_1 = arith.constant 0 : i32
    return %c0_i32, %c0_i32_0 : i32, i32
  }
  func.func @transform_4(%arg0: i32) -> (i32, i32) {
    %c0_i32 = arith.constant 0 : i32
    %c0_i32_0 = arith.constant 0 : i32
    %c0_i32_1 = arith.constant 0 : i32
    return %c0_i32, %c0_i32_0 : i32, i32
  }
  func.func @transform_5(%arg0: i32) -> (i32, i32) {
    %c0_i32 = arith.constant 0 : i32
    %c0_i32_0 = arith.constant 0 : i32
    return %arg0, %c0_i32 : i32, i32
  }
}

</mosaic_0001>

<bundles_post_ra>
// kernel: net_forward.1
= control target key start
LH: loop header
LB: loop body
LE: loop exit
PB: predicated region body
PF: predicated region fallthrough
CT: control target
= control target key end

     0   :  { %v6099_v2 = vmov 0   ;;  %vm3044_vm0 = vcmask 130048   ;;  %s8242_s0 = inlined_call_operand.vmem [shape: bf16[8,784], index: 0, kind: input, shape index: {}]   ;;  %s8243_s1 = inlined_call_operand.vmem [shape: bf16[784,1280], index: 1, kind: input, shape index: {}]   ;;  %s8244_s2 = inlined_call_operand.vmem [shape: f32[1,1280], index: 2, kind: input, shape index: {}]   ;;  %s8245_s3 = inlined_call_operand.vmem [shape: f32[1280,10], index: 3, kind: input, shape index: {}]   ;;  %s8246_s4 = inlined_call_operand.vmem [shape: f32[1,10], index: 4, kind: input, shape index: {}]   ;;  %s8247_s5 = inlined_call_operand.hbm [shape: f32[8,10], index: 5, kind: output, shape index: {}]  }
   0x1   :  { %v5327_v0 = vld [vmem:[%s8243_s1 + $0x4] ss:$40 sps:$4 sm:$0xff]   ;;  %3203 = vmatprep.mubr.bf16.mxu1 %v6099_v2  ;;  %v5331_v3 = vld [vmem:[%s8243_s1] ss:$40 sps:$4 sm:$0xff]   ;;  %v5333_v5 = vld [vmem:[%s8243_s1 + $0x54] ss:$40 sps:$4 sm:$0xff]  }
   0x2   :  { %v5329_v1 = vld [vmem:[%s8243_s1 + $0xf04] ss:$40 sps:$4 sm:$0xff]   ;;  %3048 = vmatprep.subr.bf16.mxu0 %v5327_v0  ;;  %v5332_v4 = vld [vmem:[%s8243_s1 + $0xf00] ss:$40 sps:$4 sm:$0xff]   ;;  %v5338_v8 = vld [vmem:[%s8243_s1 + $0x50] ss:$40 sps:$4 sm:$0xff]  }
   0x3   :  { %3171 = vmatprep.subr.bf16.mxu1 %v5329_v1  ;;  %3049 = vmatpush1.bf16.msra.mxu0 %v5331_v3  ;;  %v5335_v6 = vld [vmem:[%s8243_s1 + $0x8] ss:$40 sps:$4 sm:$0xff]   ;;  %v5337_v7 = vld [vmem:[%s8243_s1 + $0xc] ss:$40 sps:$4 sm:$0xff]   ;;  %v5339_v9 = vld [vmem:[%s8242_s0 + $0x18] ss:$0 sps:$4 sm:$0xff]  }
   0x4   :  { %3172 = vmatpush1.bf16.msra.mxu1 %v5332_v4  ;;  %3050 = vmatprep.subr.bf16.mxu0 %v5333_v5  ;;  %v5340_v10 = vld [vmem:[%s8243_s1 + $0xa4] ss:$40 sps:$4 sm:$0xff]   ;;  %v5342_v11 = vld [vmem:[%s8243_s1 + $0x58] ss:$40 sps:$4 sm:$0xff]   ;;  %v5346_v14 = vld [vmem:[%s8243_s1 + $0xf4] ss:$40 sps:$4 sm:$0xff]  }
   0x5   :  { %3212 = vmatprep.subr.bf16.mxu1 %v5337_v7  ;;  %v5344_v12 = vld [vmem:[%s8243_s1 + $0x5c] ss:$40 sps:$4 sm:$0xff]   ;;  %v5345_v13 = vld [vmem:[%s8243_s1 + $0xa0] ss:$40 sps:$4 sm:$0xff]   ;;  %v5350_v15 = vld [vmem:[%s8243_s1 + $0xac] ss:$40 sps:$4 sm:$0xff]  }
   0x6   :  { %v5348_v16 = vld [vmem:[%s8243_s1 + $0xa8] ss:$40 sps:$4 sm:$0xff]   ;;  %v5352_v18 = vld [vmem:[%s8243_s1 + $0x144] ss:$40 sps:$4 sm:$0xff]   ;;  %v5354_v20 = vld [vmem:[%s8243_s1 + $0xf8] ss:$40 sps:$4 sm:$0xff]  }
   0x7   :  { %4920 = vmatmul.mubr.msk.bf16.vlgmr.msra.gmra.mrb[0].mxu1 %vm3044_vm0, %v5339_v9  ;;  %3051 = vmatpush1.bf16.msra.mxu0 %v5338_v8  ;;  %v5351_v17 = vld [vmem:[%s8243_s1 + $0xf0] ss:$40 sps:$4 sm:$0xff]   ;;  %v5356_v19 = vld [vmem:[%s8243_s1 + $0xfc] ss:$40 sps:$4 sm:$0xff]   ;;  %v5357_v21 = vld [vmem:[%s8243_s1 + $0x140] ss:$40 sps:$4 sm:$0xff]  }
   0x8   :  { %3213 = vmatpush1.bf16.msra.mxu1 %v5335_v6  ;;  %3052 = vmatprep.subr.bf16.mxu0 %v5340_v10  ;;  %v5358_v22 = vld [vmem:[%s8243_s1 + $0x194] ss:$40 sps:$4 sm:$0xff]   ;;  %v5360_v24 = vld [vmem:[%s8243_s1 + $0x148] ss:$40 sps:$4 sm:$0xff]   ;;  %v5364_v26 = vld [vmem:[%s8243_s1 + $0x1e4] ss:$40 sps:$4 sm:$0xff]  }
   0x9   :  { %3214 = vmatprep.subr.bf16.mxu1 %v5344_v12  ;;  %v5362_v23 = vld [vmem:[%s8243_s1 + $0x14c] ss:$40 sps:$4 sm:$0xff]   ;;  %v5363_v25 = vld [vmem:[%s8243_s1 + $0x190] ss:$40 sps:$4 sm:$0xff]   ;;  %v5368_v27 = vld [vmem:[%s8243_s1 + $0x19c] ss:$40 sps:$4 sm:$0xff]  }
   0xa   :  { %v5366_v28 = vld [vmem:[%s8243_s1 + $0x198] ss:$40 sps:$4 sm:$0xff]   ;;  %v5370_v30 = vld [vmem:[%s8243_s1 + $0x234] ss:$40 sps:$4 sm:$0xff]   ;;  %v5372_v32 = vld [vmem:[%s8243_s1 + $0x1e8] ss:$40 sps:$4 sm:$0xff]  }
   0xb   :  { %3053 = vmatpush1.bf16.msra.mxu0 %v5345_v13  ;;  %v5369_v29 = vld [vmem:[%s8243_s1 + $0x1e0] ss:$40 sps:$4 sm:$0xff]   ;;  %v5374_v31 = vld [vmem:[%s8243_s1 + $0x1ec] ss:$40 sps:$4 sm:$0xff]   ;;  %v5375_v33 = vld [vmem:[%s8243_s1 + $0x230] ss:$40 sps:$4 sm:$0xff]  }
   0xc   :  { %3215 = vmatpush1.bf16.msra.mxu1 %v5342_v11  ;;  %3054 = vmatprep.subr.bf16.mxu0 %v5346_v14  ;;  %v5376_v34 = vld [vmem:[%s8243_s1 + $0x284] ss:$40 sps:$4 sm:$0xff]   ;;  %v5378_v36 = vld [vmem:[%s8243_s1 + $0x238] ss:$40 sps:$4 sm:$0xff]   ;;  %v5382_v38 = vld [vmem:[%s8243_s1 + $0x2d4] ss:$40 sps:$4 sm:$0xff]  }
   0xd   :  { %3216 = vmatprep.subr.bf16.mxu1 %v5350_v15  ;;  %v5380_v35 = vld [vmem:[%s8243_s1 + $0x23c] ss:$40 sps:$4 sm:$0xff]   ;;  %v5381_v37 = vld [vmem:[%s8243_s1 + $0x280] ss:$40 sps:$4 sm:$0xff]   ;;  %v5386_v39 = vld [vmem:[%s8243_s1 + $0x28c] ss:$40 sps:$4 sm:$0xff]  }
   0xe   :  { %v5384_v40 = vld [vmem:[%s8243_s1 + $0x288] ss:$40 sps:$4 sm:$0xff]   ;;  %v5388_v42 = vld [vmem:[%s8243_s1 + $0x324] ss:$40 sps:$4 sm:$0xff]   ;;  %v5390_v44 = vld [vmem:[%s8243_s1 + $0x2d8] ss:$40 sps:$4 sm:$0xff]  }
   0xf   :  { %3055 = vmatpush1.bf16.msra.mxu0 %v5351_v17  ;;  %v5387_v41 = vld [vmem:[%s8243_s1 + $0x2d0] ss:$40 sps:$4 sm:$0xff]   ;;  %v5392_v43 = vld [vmem:[%s8243_s1 + $0x2dc] ss:$40 sps:$4 sm:$0xff]   ;;  %v5393_v45 = vld [vmem:[%s8243_s1 + $0x320] ss:$40 sps:$4 sm:$0xff]  }
  0x10   :  { %3217 = vmatpush1.bf16.msra.mxu1 %v5348_v16  ;;  %3056 = vmatprep.subr.bf16.mxu0 %v5352_v18  ;;  %v5394_v46 = vld [vmem:[%s8243_s1 + $0x374] ss:$40 sps:$4 sm:$0xff]   ;;  %v5396_v48 = vld [vmem:[%s8243_s1 + $0x328] ss:$40 sps:$4 sm:$0xff]   ;;  %v22_v49 = vld [vmem:[%s8242_s0] sm:$0xff] }
  0x11   :  { %3218 = vmatprep.subr.bf16.mxu1 %v5356_v19  ;;  %v5398_v47 = vld [vmem:[%s8243_s1 + $0x32c] ss:$40 sps:$4 sm:$0xff]   ;;  %v5399_v50 = vld [vmem:[%s8243_s1 + $0x370] ss:$40 sps:$4 sm:$0xff]   ;;  %v6286_v52 = vcombine.high %v22_v49, %v22_v49  ;;  %v5404_v53 = vld [vmem:[%s8243_s1 + $0x37c] ss:$40 sps:$4 sm:$0xff]   ;;  %v6344_v8 = vcombine.low %v22_v49, %v22_v49 }
  0x12   :  { %v5400_v51 = vld [vmem:[%s8243_s1 + $0x3c4] ss:$40 sps:$4 sm:$0xff]   ;;  %v5402_v54 = vld [vmem:[%s8243_s1 + $0x378] ss:$40 sps:$4 sm:$0xff]   ;;  %v5406_v56 = vld [vmem:[%s8243_s1 + $0x414] ss:$40 sps:$4 sm:$0xff]  }
  0x13   :  { %3057 = vmatpush1.bf16.msra.mxu0 %v5357_v21  ;;  %3080 = vmatprep.mubr.bf16.mxu0 %v6286_v52  ;;  %v5405_v55 = vld [vmem:[%s8243_s1 + $0x3c0] ss:$40 sps:$4 sm:$0xff]   ;;  %v5410_v57 = vld [vmem:[%s8243_s1 + $0x3cc] ss:$40 sps:$4 sm:$0xff]   ;;  %v5411_v59 = vld [vmem:[%s8243_s1 + $0x410] ss:$40 sps:$4 sm:$0xff]  }
  0x14   :  { %3219 = vmatpush1.bf16.msra.mxu1 %v5354_v20  ;;  %3058 = vmatprep.subr.bf16.mxu0 %v5358_v22  ;;  %v5408_v58 = vld [vmem:[%s8243_s1 + $0x3c8] ss:$40 sps:$4 sm:$0xff]   ;;  %v5412_v60 = vld [vmem:[%s8243_s1 + $0x464] ss:$40 sps:$4 sm:$0xff]   ;;  %v5414_v62 = vld [vmem:[%s8243_s1 + $0x418] ss:$40 sps:$4 sm:$0xff]  }
  0x15   :  { %3220 = vmatprep.subr.bf16.mxu1 %v5362_v23  ;;  %3244 = vmatprep.mubr.bf16.mxu1 %v6286_v52  ;;  %v5416_v61 = vld [vmem:[%s8243_s1 + $0x41c] ss:$40 sps:$4 sm:$0xff]   ;;  %v5417_v63 = vld [vmem:[%s8243_s1 + $0x460] ss:$40 sps:$4 sm:$0xff]   ;;  %v5422_v1 = vld [vmem:[%s8243_s1 + $0x46c] ss:$40 sps:$4 sm:$0xff]  }
  0x16   :  { %v5418_v0 = vld [vmem:[%s8243_s1 + $0x4b4] ss:$40 sps:$4 sm:$0xff]   ;;  %v5420_v3 = vld [vmem:[%s8243_s1 + $0x468] ss:$40 sps:$4 sm:$0xff]   ;;  %v5427_v5 = vld [vmem:[%s8243_s1 + $0x504] ss:$40 sps:$4 sm:$0xff]  }
  0x17   :  { %3059 = vmatpush1.bf16.msra.mxu0 %v5363_v25  ;;  %v5423_v4 = vld [vmem:[%s8243_s1 + $0x4b0] ss:$40 sps:$4 sm:$0xff]   ;;  %v5430_v6 = vld [vmem:[%s8243_s1 + $0x4bc] ss:$40 sps:$4 sm:$0xff]   ;;  %v5425_v7 = vld [vmem:[%s8243_s1 + $0x500] ss:$40 sps:$4 sm:$0xff]  }
  0x18   :  { %3221 = vmatpush1.bf16.msra.mxu1 %v5360_v24  ;;  %3060 = vmatprep.subr.bf16.mxu0 %v5364_v26  ;;  %v5428_v9 = vld [vmem:[%s8243_s1 + $0x4b8] ss:$40 sps:$4 sm:$0xff]   ;;  %v5434_v10 = vld [vmem:[%s8243_s1 + $0x554] ss:$40 sps:$4 sm:$0xff]   ;;  %v5435_v13 = vld [vmem:[%s8243_s1 + $0x508] ss:$40 sps:$4 sm:$0xff]  }
  0x19   :  { %3222 = vmatprep.subr.bf16.mxu1 %v5368_v27  ;;  %v5437_v11 = vld [vmem:[%s8243_s1 + $0x50c] ss:$40 sps:$4 sm:$0xff]   ;;  %v5432_v12 = vld [vmem:[%s8243_s1 + $0x550] ss:$40 sps:$4 sm:$0xff]   ;;  %v5443_v15 = vld [vmem:[%s8243_s1 + $0x55c] ss:$40 sps:$4 sm:$0xff]  }
  0x1a   :  { %v5440_v14 = vld [vmem:[%s8243_s1 + $0x5a4] ss:$40 sps:$4 sm:$0xff]   ;;  %v5438_v16 = vld [vmem:[%s8243_s1 + $0x5a0] ss:$40 sps:$4 sm:$0xff]   ;;  %v5446_v18 = vld [vmem:[%s8243_s1 + $0x5f4] ss:$40 sps:$4 sm:$0xff]  }
  0x1b   :  { %3061 = vmatpush1.bf16.msra.mxu0 %v5369_v29  ;;  %v5441_v17 = vld [vmem:[%s8243_s1 + $0x558] ss:$40 sps:$4 sm:$0xff]   ;;  %v5449_v19 = vld [vmem:[%s8243_s1 + $0x5ac] ss:$40 sps:$4 sm:$0xff]   ;;  %v5447_v21 = vld [vmem:[%s8243_s1 + $0x5a8] ss:$40 sps:$4 sm:$0xff]  }
  0x1c   :  { %3223 = vmatpush1.bf16.msra.mxu1 %v5366_v28  ;;  %3062 = vmatprep.subr.bf16.mxu0 %v5370_v30  ;;  %v5444_v20 = vld [vmem:[%s8243_s1 + $0x5f0] ss:$40 sps:$4 sm:$0xff]   ;;  %v5452_v22 = vld [vmem:[%s8243_s1 + $0x644] ss:$40 sps:$4 sm:$0xff]   ;;  %v5450_v24 = vld [vmem:[%s8243_s1 + $0x640] ss:$40 sps:$4 sm:$0xff]  }
  0x1d   :  { %3224 = vmatprep.subr.bf16.mxu1 %v5374_v31  ;;  %v5455_v23 = vld [vmem:[%s8243_s1 + $0x5fc] ss:$40 sps:$4 sm:$0xff]   ;;  %v5453_v25 = vld [vmem:[%s8243_s1 + $0x5f8] ss:$40 sps:$4 sm:$0xff]   ;;  %v5461_v27 = vld [vmem:[%s8243_s1 + $0x64c] ss:$40 sps:$4 sm:$0xff]  }
  0x1e   :  { %v5458_v26 = vld [vmem:[%s8243_s1 + $0x694] ss:$40 sps:$4 sm:$0xff]   ;;  %v5456_v28 = vld [vmem:[%s8243_s1 + $0x690] ss:$40 sps:$4 sm:$0xff]   ;;  %v5464_v30 = vld [vmem:[%s8243_s1 + $0x6e4] ss:$40 sps:$4 sm:$0xff]  }
  0x1f   :  { %3063 = vmatpush1.bf16.msra.mxu0 %v5375_v33  ;;  %v5459_v29 = vld [vmem:[%s8243_s1 + $0x648] ss:$40 sps:$4 sm:$0xff]   ;;  %v5467_v31 = vld [vmem:[%s8243_s1 + $0x69c] ss:$40 sps:$4 sm:$0xff]  }
  0x20   :  { %3225 = vmatpush1.bf16.msra.mxu1 %v5372_v32  ;;  %3064 = vmatprep.subr.bf16.mxu0 %v5376_v34  ;;  %v6420_v32 = vld [vmem:[%s8242_s0 + $0x8] sm:$0xff]  ;;  %v5465_v34 = vld [vmem:[%s8243_s1 + $0x698] ss:$40 sps:$4 sm:$0xff]   ;;  %v5491_v49 = vld [vmem:[%s8243_s1 + $0x7dc] ss:$40 sps:$4 sm:$0xff]  }
  0x21   :  { %3226 = vmatprep.subr.bf16.mxu1 %v5380_v35  ;;  %v5462_v33 = vld [vmem:[%s8243_s1 + $0x6e0] ss:$40 sps:$4 sm:$0xff]   ;;  %v6430_v35 = vcombine.high %v6420_v32, %v6420_v32 }
  0x23   :  { %3065 = vmatpush1.bf16.msra.mxu0 %v5381_v37  ;;  %v5473_v37 = vld [vmem:[%s8243_s1 + $0x6ec] ss:$40 sps:$4 sm:$0xff]  }
  0x24   :  { %3227 = vmatpush1.bf16.msra.mxu1 %v5378_v36  ;;  %3066 = vmatprep.subr.bf16.mxu0 %v5382_v38  ;;  %v5470_v36 = vld [vmem:[%s8243_s1 + $0x734] ss:$40 sps:$4 sm:$0xff]   ;;  %v5468_v38 = vld [vmem:[%s8243_s1 + $0x730] ss:$40 sps:$4 sm:$0xff]  }
  0x25   :  { %3228 = vmatprep.subr.bf16.mxu1 %v5386_v39  ;;  %v5471_v39 = vld [vmem:[%s8243_s1 + $0x6e8] ss:$40 sps:$4 sm:$0xff]  }
  0x27   :  { %3067 = vmatpush1.bf16.msra.mxu0 %v5387_v41  ;;  %v5479_v41 = vld [vmem:[%s8243_s1 + $0x73c] ss:$40 sps:$4 sm:$0xff]  }
  0x28   :  { %3229 = vmatpush1.bf16.msra.mxu1 %v5384_v40  ;;  %3068 = vmatprep.subr.bf16.mxu0 %v5388_v42  ;;  %v5476_v40 = vld [vmem:[%s8243_s1 + $0x784] ss:$40 sps:$4 sm:$0xff]   ;;  %v5474_v42 = vld [vmem:[%s8243_s1 + $0x780] ss:$40 sps:$4 sm:$0xff]  }
  0x29   :  { %3230 = vmatprep.subr.bf16.mxu1 %v5392_v43  ;;  %v5477_v43 = vld [vmem:[%s8243_s1 + $0x738] ss:$40 sps:$4 sm:$0xff]  }
  0x2b   :  { %3069 = vmatpush1.bf16.msra.mxu0 %v5393_v45  ;;  %v5485_v45 = vld [vmem:[%s8243_s1 + $0x78c] ss:$40 sps:$4 sm:$0xff]  }
  0x2c   :  { %3231 = vmatpush1.bf16.msra.mxu1 %v5390_v44  ;;  %3070 = vmatprep.subr.bf16.mxu0 %v5394_v46  ;;  %v5482_v44 = vld [vmem:[%s8243_s1 + $0x7d4] ss:$40 sps:$4 sm:$0xff]   ;;  %v5480_v46 = vld [vmem:[%s8243_s1 + $0x7d0] ss:$40 sps:$4 sm:$0xff]  }
  0x2d   :  { %3232 = vmatprep.subr.bf16.mxu1 %v5398_v47  ;;  %v5483_v47 = vld [vmem:[%s8243_s1 + $0x788] ss:$40 sps:$4 sm:$0xff]  }
  0x2f   :  { %3071 = vmatpush1.bf16.msra.mxu0 %v5399_v50  ;;  %v5486_v50 = vld [vmem:[%s8243_s1 + $0x820] ss:$40 sps:$4 sm:$0xff]  }
  0x30   :  { %3233 = vmatpush1.bf16.msra.mxu1 %v5396_v48  ;;  %3072 = vmatprep.subr.bf16.mxu0 %v5400_v51  ;;  %v5488_v48 = vld [vmem:[%s8243_s1 + $0x824] ss:$40 sps:$4 sm:$0xff]   ;;  %v5489_v51 = vld [vmem:[%s8243_s1 + $0x7d8] ss:$40 sps:$4 sm:$0xff]  }
  0x31   :  { %3234 = vmatprep.subr.bf16.mxu1 %v5404_v53  ;;  %v5494_v53 = vld [vmem:[%s8243_s1 + $0x874] ss:$40 sps:$4 sm:$0xff]  }
  0x33   :  { %3073 = vmatpush1.bf16.msra.mxu0 %v5405_v55  ;;  %v5492_v55 = vld [vmem:[%s8243_s1 + $0x870] ss:$40 sps:$4 sm:$0xff]  }
  0x34   :  { %3235 = vmatpush1.bf16.msra.mxu1 %v5402_v54  ;;  %3074 = vmatprep.subr.bf16.mxu0 %v5406_v56  ;;  %v5497_v54 = vld [vmem:[%s8243_s1 + $0x82c] ss:$40 sps:$4 sm:$0xff]   ;;  %v5495_v56 = vld [vmem:[%s8243_s1 + $0x828] ss:$40 sps:$4 sm:$0xff]  }
  0x35   :  { %3236 = vmatprep.subr.bf16.mxu1 %v5410_v57  ;;  %v5500_v57 = vld [vmem:[%s8243_s1 + $0x8c4] ss:$40 sps:$4 sm:$0xff]  }
  0x37   :  { %3075 = vmatpush1.bf16.msra.mxu0 %v5411_v59  ;;  %v5498_v59 = vld [vmem:[%s8243_s1 + $0x8c0] ss:$40 sps:$4 sm:$0xff]  }
  0x38   :  { %3237 = vmatpush1.bf16.msra.mxu1 %v5408_v58  ;;  %3076 = vmatprep.subr.bf16.mxu0 %v5412_v60  ;;  %v5503_v58 = vld [vmem:[%s8243_s1 + $0x87c] ss:$40 sps:$4 sm:$0xff]   ;;  %v5501_v60 = vld [vmem:[%s8243_s1 + $0x878] ss:$40 sps:$4 sm:$0xff]  }
  0x39   :  { %3238 = vmatprep.subr.bf16.mxu1 %v5416_v61  ;;  %v5506_v61 = vld [vmem:[%s8243_s1 + $0x914] ss:$40 sps:$4 sm:$0xff]  }
  0x3b   :  { %3077 = vmatpush1.bf16.msra.mxu0 %v5417_v63  ;;  %v5504_v63 = vld [vmem:[%s8243_s1 + $0x910] ss:$40 sps:$4 sm:$0xff]  }
  0x3c   :  { %3239 = vmatpush1.bf16.msra.mxu1 %v5414_v62  ;;  %3078 = vmatprep.subr.bf16.mxu0 %v5418_v0  ;;  %v5509_v62 = vld [vmem:[%s8243_s1 + $0x8cc] ss:$40 sps:$4 sm:$0xff]   ;;  %v5507_v0 = vld [vmem:[%s8243_s1 + $0x8c8] ss:$40 sps:$4 sm:$0xff]  }
  0x3d   :  { %3240 = vmatprep.subr.bf16.mxu1 %v5422_v1  ;;  %v5512_v1 = vld [vmem:[%s8243_s1 + $0x964] ss:$40 sps:$4 sm:$0xff]  }
  0x3f   :  { %3079 = vmatpush1.bf16.msra.mxu0 %v5423_v4  ;;  %v5510_v4 = vld [vmem:[%s8243_s1 + $0x960] ss:$40 sps:$4 sm:$0xff]  }
  0x40   :  { %3241 = vmatpush1.bf16.msra.mxu1 %v5420_v3  ;;  %3089 = vmatprep.subr.bf16.mxu0 %v5427_v5  ;;  %v5515_v3 = vld [vmem:[%s8243_s1 + $0x91c] ss:$40 sps:$4 sm:$0xff]   ;;  %v5513_v5 = vld [vmem:[%s8243_s1 + $0x918] ss:$40 sps:$4 sm:$0xff]  }
  0x41   :  { %3242 = vmatprep.subr.bf16.mxu1 %v5430_v6  ;;  %v5518_v6 = vld [vmem:[%s8243_s1 + $0x9b4] ss:$40 sps:$4 sm:$0xff]  }
  0x42   :  { %3081 = vmatmul.mubr.bf16.vlgmr.msra.gmra.mrb[0].mxu0 %v6344_v8 }
  0x43   :  { %3090 = vmatpush1.bf16.msra.mxu0 %v5425_v7  ;;  %3121 = vmatprep.mubr.bf16.mxu0 %v6430_v35  ;;  %v5521_v7 = vld [vmem:[%s8243_s1 + $0x96c] ss:$40 sps:$4 sm:$0xff]  }
  0x44   :  { %3243 = vmatpush1.bf16.msra.mxu1 %v5428_v9  ;;  %3091 = vmatprep.subr.bf16.mxu0 %v5434_v10  ;;  %v5516_v9 = vld [vmem:[%s8243_s1 + $0x9b0] ss:$40 sps:$4 sm:$0xff]  }
  0x45   :  { %3253 = vmatprep.subr.bf16.mxu1 %v5437_v11  ;;  %v5519_v10 = vld [vmem:[%s8243_s1 + $0x968] ss:$40 sps:$4 sm:$0xff]   ;;  %v5525_v11 = vld [vmem:[%s8243_s1 + $0xa04] ss:$40 sps:$4 sm:$0xff]  }
  0x47   :  { %3245 = vmatmul.mubr.bf16.vlgmr.msra.gmra.mrb[4].mxu1 %v6344_v8  ;;  %3092 = vmatpush1.bf16.msra.mxu0 %v5432_v12  ;;  %v5528_v12 = vld [vmem:[%s8243_s1 + $0x9bc] ss:$40 sps:$4 sm:$0xff]  }
  0x48   :  { %3254 = vmatpush1.bf16.msra.mxu1 %v5435_v13  ;;  %3093 = vmatprep.subr.bf16.mxu0 %v5440_v14  ;;  %v5523_v13 = vld [vmem:[%s8243_s1 + $0xa00] ss:$40 sps:$4 sm:$0xff]  }
  0x49   :  { %3255 = vmatprep.subr.bf16.mxu1 %v5443_v15  ;;  %3285 = vmatprep.mubr.bf16.mxu1 %v6430_v35  ;;  %v5526_v14 = vld [vmem:[%s8243_s1 + $0x9b8] ss:$40 sps:$4 sm:$0xff]   ;;  %v6556_v15 = vcombine.low %v6420_v32, %v6420_v32 }
  0x4a   :  { %v5548_v32 = vld [vmem:[%s8243_s1 + $0xb40] ss:$40 sps:$4 sm:$0xff]  }
  0x4b   :  { %3094 = vmatpush1.bf16.msra.mxu0 %v5438_v16  ;;  %v5532_v16 = vld [vmem:[%s8243_s1 + $0xa54] ss:$40 sps:$4 sm:$0xff]  }
  0x4c   :  { %3256 = vmatpush1.bf16.msra.mxu1 %v5441_v17  ;;  %3095 = vmatprep.subr.bf16.mxu0 %v5446_v18  ;;  %v5535_v17 = vld [vmem:[%s8243_s1 + $0xa0c] ss:$40 sps:$4 sm:$0xff]  }
  0x4d   :  { %3257 = vmatprep.subr.bf16.mxu1 %v5449_v19  ;;  %v6567_v18 = vld [vmem:[%s8242_s0 + $0x10] sm:$0xff] }
  0x4e   :  { %v6571_v19 = vcombine.high %v6567_v18, %v6567_v18 }
  0x4f   :  { %3096 = vmatpush1.bf16.msra.mxu0 %v5444_v20  ;;  %v5530_v20 = vld [vmem:[%s8243_s1 + $0xa50] ss:$40 sps:$4 sm:$0xff]  }
  0x50   :  { %3258 = vmatpush1.bf16.msra.mxu1 %v5447_v21  ;;  %3097 = vmatprep.subr.bf16.mxu0 %v5452_v22  ;;  %v5533_v21 = vld [vmem:[%s8243_s1 + $0xa08] ss:$40 sps:$4 sm:$0xff]   ;;  %v5538_v22 = vld [vmem:[%s8243_s1 + $0xaa4] ss:$40 sps:$4 sm:$0xff]  }
  0x51   :  { %3259 = vmatprep.subr.bf16.mxu1 %v5455_v23  ;;  %v5541_v23 = vld [vmem:[%s8243_s1 + $0xa5c] ss:$40 sps:$4 sm:$0xff]  }
  0x53   :  { %3098 = vmatpush1.bf16.msra.mxu0 %v5450_v24  ;;  %v5536_v24 = vld [vmem:[%s8243_s1 + $0xaa0] ss:$40 sps:$4 sm:$0xff]  }
  0x54   :  { %3260 = vmatpush1.bf16.msra.mxu1 %v5453_v25  ;;  %3099 = vmatprep.subr.bf16.mxu0 %v5458_v26  ;;  %v5539_v25 = vld [vmem:[%s8243_s1 + $0xa58] ss:$40 sps:$4 sm:$0xff]   ;;  %v5544_v26 = vld [vmem:[%s8243_s1 + $0xaf4] ss:$40 sps:$4 sm:$0xff]  }
  0x55   :  { %3261 = vmatprep.subr.bf16.mxu1 %v5461_v27  ;;  %v5547_v27 = vld [vmem:[%s8243_s1 + $0xaac] ss:$40 sps:$4 sm:$0xff]  }
  0x57   :  { %3100 = vmatpush1.bf16.msra.mxu0 %v5456_v28  ;;  %v5542_v28 = vld [vmem:[%s8243_s1 + $0xaf0] ss:$40 sps:$4 sm:$0xff]  }
  0x58   :  { %3262 = vmatpush1.bf16.msra.mxu1 %v5459_v29  ;;  %3101 = vmatprep.subr.bf16.mxu0 %v5464_v30  ;;  %v5545_v29 = vld [vmem:[%s8243_s1 + $0xaa8] ss:$40 sps:$4 sm:$0xff]   ;;  %v5550_v30 = vld [vmem:[%s8243_s1 + $0xb44] ss:$40 sps:$4 sm:$0xff]  }
  0x59   :  { %3263 = vmatprep.subr.bf16.mxu1 %v5467_v31  ;;  %v5553_v31 = vld [vmem:[%s8243_s1 + $0xafc] ss:$40 sps:$4 sm:$0xff]  }
  0x5b   :  { %3102 = vmatpush1.bf16.msra.mxu0 %v5462_v33  ;;  %v5551_v33 = vld [vmem:[%s8243_s1 + $0xaf8] ss:$40 sps:$4 sm:$0xff]  }
  0x5c   :  { %3264 = vmatpush1.bf16.msra.mxu1 %v5465_v34  ;;  %3103 = vmatprep.subr.bf16.mxu0 %v5470_v36  ;;  %v5556_v34 = vld [vmem:[%s8243_s1 + $0xb94] ss:$40 sps:$4 sm:$0xff]  }
  0x5d   :  { %3265 = vmatprep.subr.bf16.mxu1 %v5473_v37  ;;  %v5559_v36 = vld [vmem:[%s8243_s1 + $0xb4c] ss:$40 sps:$4 sm:$0xff]   ;;  %v5554_v37 = vld [vmem:[%s8243_s1 + $0xb90] ss:$40 sps:$4 sm:$0xff]  }
  0x5f   :  { %3104 = vmatpush1.bf16.msra.mxu0 %v5468_v38  ;;  %v5557_v38 = vld [vmem:[%s8243_s1 + $0xb48] ss:$40 sps:$4 sm:$0xff]  }
  0x60   :  { %3266 = vmatpush1.bf16.msra.mxu1 %v5471_v39  ;;  %3105 = vmatprep.subr.bf16.mxu0 %v5476_v40  ;;  %v5562_v39 = vld [vmem:[%s8243_s1 + $0xbe4] ss:$40 sps:$4 sm:$0xff]  }
  0x61   :  { %3267 = vmatprep.subr.bf16.mxu1 %v5479_v41  ;;  %v5565_v40 = vld [vmem:[%s8243_s1 + $0xb9c] ss:$40 sps:$4 sm:$0xff]   ;;  %v5560_v41 = vld [vmem:[%s8243_s1 + $0xbe0] ss:$40 sps:$4 sm:$0xff]  }
  0x63   :  { %3106 = vmatpush1.bf16.msra.mxu0 %v5474_v42  ;;  %v5563_v42 = vld [vmem:[%s8243_s1 + $0xb98] ss:$40 sps:$4 sm:$0xff]  }
  0x64   :  { %3268 = vmatpush1.bf16.msra.mxu1 %v5477_v43  ;;  %3107 = vmatprep.subr.bf16.mxu0 %v5482_v44  ;;  %v5568_v43 = vld [vmem:[%s8243_s1 + $0xc34] ss:$40 sps:$4 sm:$0xff]  }
  0x65   :  { %3269 = vmatprep.subr.bf16.mxu1 %v5485_v45  ;;  %v5571_v44 = vld [vmem:[%s8243_s1 + $0xbec] ss:$40 sps:$4 sm:$0xff]   ;;  %v5566_v45 = vld [vmem:[%s8243_s1 + $0xc30] ss:$40 sps:$4 sm:$0xff]  }
  0x67   :  { %3108 = vmatpush1.bf16.msra.mxu0 %v5480_v46  ;;  %v5569_v46 = vld [vmem:[%s8243_s1 + $0xbe8] ss:$40 sps:$4 sm:$0xff]  }
  0x68   :  { %3270 = vmatpush1.bf16.msra.mxu1 %v5483_v47  ;;  %3109 = vmatprep.subr.bf16.mxu0 %v5488_v48  ;;  %v5574_v47 = vld [vmem:[%s8243_s1 + $0xc84] ss:$40 sps:$4 sm:$0xff]  }
  0x69   :  { %3271 = vmatprep.subr.bf16.mxu1 %v5491_v49  ;;  %v5577_v48 = vld [vmem:[%s8243_s1 + $0xc3c] ss:$40 sps:$4 sm:$0xff]   ;;  %v5572_v49 = vld [vmem:[%s8243_s1 + $0xc80] ss:$40 sps:$4 sm:$0xff]  }
  0x6b   :  { %3110 = vmatpush1.bf16.msra.mxu0 %v5486_v50  ;;  %v5575_v50 = vld [vmem:[%s8243_s1 + $0xc38] ss:$40 sps:$4 sm:$0xff]  }
  0x6c   :  { %3272 = vmatpush1.bf16.msra.mxu1 %v5489_v51  ;;  %3111 = vmatprep.subr.bf16.mxu0 %v5494_v53  ;;  %v5580_v51 = vld [vmem:[%s8243_s1 + $0xcd4] ss:$40 sps:$4 sm:$0xff]  }
  0x6d   :  { %3273 = vmatprep.subr.bf16.mxu1 %v5497_v54  ;;  %v5583_v53 = vld [vmem:[%s8243_s1 + $0xc8c] ss:$40 sps:$4 sm:$0xff]   ;;  %v5578_v54 = vld [vmem:[%s8243_s1 + $0xcd0] ss:$40 sps:$4 sm:$0xff]  }
  0x6f   :  { %3112 = vmatpush1.bf16.msra.mxu0 %v5492_v55  ;;  %v5581_v55 = vld [vmem:[%s8243_s1 + $0xc88] ss:$40 sps:$4 sm:$0xff]  }
  0x70   :  { %3274 = vmatpush1.bf16.msra.mxu1 %v5495_v56  ;;  %3113 = vmatprep.subr.bf16.mxu0 %v5500_v57  ;;  %v5586_v56 = vld [vmem:[%s8243_s1 + $0xd24] ss:$40 sps:$4 sm:$0xff]  }
  0x71   :  { %3275 = vmatprep.subr.bf16.mxu1 %v5503_v58  ;;  %v5589_v57 = vld [vmem:[%s8243_s1 + $0xcdc] ss:$40 sps:$4 sm:$0xff]   ;;  %v5584_v58 = vld [vmem:[%s8243_s1 + $0xd20] ss:$40 sps:$4 sm:$0xff]  }
  0x73   :  { %3114 = vmatpush1.bf16.msra.mxu0 %v5498_v59  ;;  %v5587_v59 = vld [vmem:[%s8243_s1 + $0xcd8] ss:$40 sps:$4 sm:$0xff]  }
  0x74   :  { %3276 = vmatpush1.bf16.msra.mxu1 %v5501_v60  ;;  %3115 = vmatprep.subr.bf16.mxu0 %v5506_v61  ;;  %v5592_v60 = vld [vmem:[%s8243_s1 + $0xd74] ss:$40 sps:$4 sm:$0xff]  }
  0x75   :  { %3277 = vmatprep.subr.bf16.mxu1 %v5509_v62  ;;  %v5595_v61 = vld [vmem:[%s8243_s1 + $0xd2c] ss:$40 sps:$4 sm:$0xff]   ;;  %v5590_v62 = vld [vmem:[%s8243_s1 + $0xd70] ss:$40 sps:$4 sm:$0xff]  }
  0x77   :  { %3116 = vmatpush1.bf16.msra.mxu0 %v5504_v63  ;;  %v5593_v63 = vld [vmem:[%s8243_s1 + $0xd28] ss:$40 sps:$4 sm:$0xff]  }
  0x78   :  { %3278 = vmatpush1.bf16.msra.mxu1 %v5507_v0  ;;  %3117 = vmatprep.subr.bf16.mxu0 %v5512_v1  ;;  %v5598_v0 = vld [vmem:[%s8243_s1 + $0xdc4] ss:$40 sps:$4 sm:$0xff]  }
  0x79   :  { %3279 = vmatprep.subr.bf16.mxu1 %v5515_v3  ;;  %v5601_v1 = vld [vmem:[%s8243_s1 + $0xd7c] ss:$40 sps:$4 sm:$0xff]   ;;  %v5596_v3 = vld [vmem:[%s8243_s1 + $0xdc0] ss:$40 sps:$4 sm:$0xff]  }
  0x7b   :  { %3118 = vmatpush1.bf16.msra.mxu0 %v5510_v4  ;;  %v5599_v4 = vld [vmem:[%s8243_s1 + $0xd78] ss:$40 sps:$4 sm:$0xff]  }
  0x7c   :  { %3280 = vmatpush1.bf16.msra.mxu1 %v5513_v5  ;;  %3119 = vmatprep.subr.bf16.mxu0 %v5518_v6  ;;  %v5604_v5 = vld [vmem:[%s8243_s1 + $0xe14] ss:$40 sps:$4 sm:$0xff]  }
  0x7d   :  { %3281 = vmatprep.subr.bf16.mxu1 %v5521_v7  ;;  %v5607_v6 = vld [vmem:[%s8243_s1 + $0xdcc] ss:$40 sps:$4 sm:$0xff]   ;;  %v5602_v7 = vld [vmem:[%s8243_s1 + $0xe10] ss:$40 sps:$4 sm:$0xff]  }
  0x7f   :  { %3120 = vmatpush1.bf16.msra.mxu0 %v5516_v9  ;;  %v5605_v9 = vld [vmem:[%s8243_s1 + $0xdc8] ss:$40 sps:$4 sm:$0xff]  }
  0x80   :  { %3282 = vmatpush1.bf16.msra.mxu1 %v5519_v10  ;;  %3130 = vmatprep.subr.bf16.mxu0 %v5525_v11  ;;  %v5610_v10 = vld [vmem:[%s8243_s1 + $0xe64] ss:$40 sps:$4 sm:$0xff]  }
  0x81   :  { %3283 = vmatprep.subr.bf16.mxu1 %v5528_v12  ;;  %v5613_v11 = vld [vmem:[%s8243_s1 + $0xe1c] ss:$40 sps:$4 sm:$0xff]   ;;  %v5608_v12 = vld [vmem:[%s8243_s1 + $0xe60] ss:$40 sps:$4 sm:$0xff]  }
  0x82   :  { %3122 = vmatmul.mubr.bf16.vlgmr.msra.gmra.mrb[0].mxu0 %v6556_v15 }
  0x83   :  { %3131 = vmatpush1.bf16.msra.mxu0 %v5523_v13  ;;  %3162 = vmatprep.mubr.bf16.mxu0 %v6571_v19  ;;  %v5611_v13 = vld [vmem:[%s8243_s1 + $0xe18] ss:$40 sps:$4 sm:$0xff]  }
  0x84   :  { %3284 = vmatpush1.bf16.msra.mxu1 %v5526_v14  ;;  %3132 = vmatprep.subr.bf16.mxu0 %v5532_v16  ;;  %v5616_v14 = vld [vmem:[%s8243_s1 + $0xeb4] ss:$40 sps:$4 sm:$0xff]  }
  0x85   :  { %3294 = vmatprep.subr.bf16.mxu1 %v5535_v17  ;;  %v5619_v16 = vld [vmem:[%s8243_s1 + $0xe6c] ss:$40 sps:$4 sm:$0xff]   ;;  %v5614_v17 = vld [vmem:[%s8243_s1 + $0xeb0] ss:$40 sps:$4 sm:$0xff]  }
  0x87   :  { %3286 = vmatmul.mubr.bf16.vlgmr.msra.gmra.mrb[4].mxu1 %v6556_v15  ;;  %3133 = vmatpush1.bf16.msra.mxu0 %v5530_v20  ;;  %v5617_v20 = vld [vmem:[%s8243_s1 + $0xe68] ss:$40 sps:$4 sm:$0xff]  }
  0x88   :  { %3295 = vmatpush1.bf16.msra.mxu1 %v5533_v21  ;;  %3134 = vmatprep.subr.bf16.mxu0 %v5538_v22  ;;  %v5624_v21 = vld [vmem:[%s8243_s1 + $0xebc] ss:$40 sps:$4 sm:$0xff]  }
  0x89   :  { %3296 = vmatprep.subr.bf16.mxu1 %v5541_v23  ;;  %3326 = vmatprep.mubr.bf16.mxu1 %v6571_v19  ;;  %v5627_v22 = vld [vmem:[%s8243_s1 + $0x14] ss:$40 sps:$4 sm:$0xff]   ;;  %v6759_v23 = vcombine.low %v6567_v18, %v6567_v18 }
  0x8a   :  { %v5636_v18 = vld [vmem:[%s8243_s1 + $0xf0c] ss:$40 sps:$4 sm:$0xff]  }
  0x8b   :  { %3135 = vmatpush1.bf16.msra.mxu0 %v5536_v24  ;;  %v5622_v24 = vld [vmem:[%s8243_s1 + $0xeb8] ss:$40 sps:$4 sm:$0xff]  }
  0x8c   :  { %3297 = vmatpush1.bf16.msra.mxu1 %v5539_v25  ;;  %3136 = vmatprep.subr.bf16.mxu0 %v5544_v26  ;;  %v5625_v25 = vld [vmem:[%s8243_s1 + $0x10] ss:$40 sps:$4 sm:$0xff]   ;;  %v5630_v26 = vld [vmem:[%s8243_s1 + $0x64] ss:$40 sps:$4 sm:$0xff]  }
  0x8d   :  { %3298 = vmatprep.subr.bf16.mxu1 %v5547_v27  ;;  %v5628_v27 = vld [vmem:[%s8243_s1 + $0x60] ss:$40 sps:$4 sm:$0xff]  }
  0x8f   :  { %3137 = vmatpush1.bf16.msra.mxu0 %v5542_v28  ;;  %v5634_v28 = vld [vmem:[%s8243_s1 + $0xf08] ss:$40 sps:$4 sm:$0xff]  }
  0x90   :  { %3299 = vmatpush1.bf16.msra.mxu1 %v5545_v29  ;;  %3138 = vmatprep.subr.bf16.mxu0 %v5550_v30  ;;  %v5633_v29 = vld [vmem:[%s8243_s1 + $0xb4] ss:$40 sps:$4 sm:$0xff]  }
  0x91   :  { %3300 = vmatprep.subr.bf16.mxu1 %v5553_v31  ;;  %v5645_v30 = vld [vmem:[%s8243_s1 + $0xf14] ss:$40 sps:$4 sm:$0xff]   ;;  %v5631_v31 = vld [vmem:[%s8243_s1 + $0xb0] ss:$40 sps:$4 sm:$0xff]  }
  0x93   :  { %3139 = vmatpush1.bf16.msra.mxu0 %v5548_v32  ;;  %v5639_v32 = vld [vmem:[%s8243_s1 + $0x104] ss:$40 sps:$4 sm:$0xff]  }
  0x94   :  { %3301 = vmatpush1.bf16.msra.mxu1 %v5551_v33  ;;  %3140 = vmatprep.subr.bf16.mxu0 %v5556_v34  ;;  %v5637_v33 = vld [vmem:[%s8243_s1 + $0x100] ss:$40 sps:$4 sm:$0xff]   ;;  %v5642_v34 = vld [vmem:[%s8243_s1 + $0x154] ss:$40 sps:$4 sm:$0xff]  }
  0x95   :  { %3302 = vmatprep.subr.bf16.mxu1 %v5559_v36  ;;  %v5640_v36 = vld [vmem:[%s8243_s1 + $0x150] ss:$40 sps:$4 sm:$0xff]  }
  0x97   :  { %3141 = vmatpush1.bf16.msra.mxu0 %v5554_v37  ;;  %v5643_v37 = vld [vmem:[%s8243_s1 + $0xf10] ss:$40 sps:$4 sm:$0xff]  }
  0x98   :  { %3303 = vmatpush1.bf16.msra.mxu1 %v5557_v38  ;;  %3142 = vmatprep.subr.bf16.mxu0 %v5562_v39  ;;  %v5648_v38 = vld [vmem:[%s8243_s1 + $0x1a4] ss:$40 sps:$4 sm:$0xff]  }
  0x99   :  { %3304 = vmatprep.subr.bf16.mxu1 %v5565_v40  ;;  %v5651_v39 = vld [vmem:[%s8243_s1 + $0x1c] ss:$40 sps:$4 sm:$0xff]   ;;  %v6073_v40 = vld [vmem:[%s8242_s0 + $0x18] ss:$0 sps:$4 sm:$0xff]  }
  0x9b   :  { %3143 = vmatpush1.bf16.msra.mxu0 %v5560_v41  ;;  %v5646_v41 = vld [vmem:[%s8243_s1 + $0x1a0] ss:$40 sps:$4 sm:$0xff]  }
  0x9c   :  { %3305 = vmatpush1.bf16.msra.mxu1 %v5563_v42  ;;  %3144 = vmatprep.subr.bf16.mxu0 %v5568_v43  ;;  %v5654_v42 = vld [vmem:[%s8243_s1 + $0x1f4] ss:$40 sps:$4 sm:$0xff]   ;;  %v5649_v43 = vld [vmem:[%s8243_s1 + $0x18] ss:$40 sps:$4 sm:$0xff]  }
  0x9d   :  { %3306 = vmatprep.subr.bf16.mxu1 %v5571_v44  ;;  %v5652_v44 = vld [vmem:[%s8243_s1 + $0x1f0] ss:$40 sps:$4 sm:$0xff]  }
  0x9f   :  { %3145 = vmatpush1.bf16.msra.mxu0 %v5566_v45  ;;  %v5657_v45 = vld [vmem:[%s8243_s1 + $0x6c] ss:$40 sps:$4 sm:$0xff]  }
  0xa0   :  { %3307 = vmatpush1.bf16.msra.mxu1 %v5569_v46  ;;  %3146 = vmatprep.subr.bf16.mxu0 %v5574_v47  ;;  %v5660_v46 = vld [vmem:[%s8243_s1 + $0x244] ss:$40 sps:$4 sm:$0xff]  }
  0xa1   :  { %3308 = vmatprep.subr.bf16.mxu1 %v5577_v48  ;;  %v5655_v48 = vld [vmem:[%s8243_s1 + $0x68] ss:$40 sps:$4 sm:$0xff]  }
  0xa3   :  { %3147 = vmatpush1.bf16.msra.mxu0 %v5572_v49 }
  0xa4   :  { %3309 = vmatpush1.bf16.msra.mxu1 %v5575_v50  ;;  %3148 = vmatprep.subr.bf16.mxu0 %v5580_v51  ;;  %v5658_v50 = vld [vmem:[%s8243_s1 + $0x240] ss:$40 sps:$4 sm:$0xff]  }
  0xa5   :  { %3310 = vmatprep.subr.bf16.mxu1 %v5583_v53  ;;  %v5663_v53 = vld [vmem:[%s8243_s1 + $0xbc] ss:$40 sps:$4 sm:$0xff]  }
  0xa7   :  { %3149 = vmatpush1.bf16.msra.mxu0 %v5578_v54  ;;  %v5666_v54 = vld [vmem:[%s8243_s1 + $0x294] ss:$40 sps:$4 sm:$0xff]  }
  0xa8   :  { %3311 = vmatpush1.bf16.msra.mxu1 %v5581_v55  ;;  %3150 = vmatprep.subr.bf16.mxu0 %v5586_v56  ;;  %v5661_v56 = vld [vmem:[%s8243_s1 + $0xb8] ss:$40 sps:$4 sm:$0xff]  }
  0xa9   :  { %3312 = vmatprep.subr.bf16.mxu1 %v5589_v57  ;;  %v5664_v57 = vld [vmem:[%s8243_s1 + $0x290] ss:$40 sps:$4 sm:$0xff]  }
  0xab   :  { %3151 = vmatpush1.bf16.msra.mxu0 %v5584_v58  ;;  %v5669_v58 = vld [vmem:[%s8243_s1 + $0x10c] ss:$40 sps:$4 sm:$0xff]  }
  0xac   :  { %3313 = vmatpush1.bf16.msra.mxu1 %v5587_v59  ;;  %3152 = vmatprep.subr.bf16.mxu0 %v5592_v60  ;;  %v5672_v59 = vld [vmem:[%s8243_s1 + $0x2e4] ss:$40 sps:$4 sm:$0xff]   ;;  %v5667_v60 = vld [vmem:[%s8243_s1 + $0x108] ss:$40 sps:$4 sm:$0xff]  }
  0xad   :  { %3314 = vmatprep.subr.bf16.mxu1 %v5595_v61  ;;  %v5670_v61 = vld [vmem:[%s8243_s1 + $0x2e0] ss:$40 sps:$4 sm:$0xff]  }
  0xaf   :  { %3153 = vmatpush1.bf16.msra.mxu0 %v5590_v62  ;;  %v5675_v62 = vld [vmem:[%s8243_s1 + $0x15c] ss:$40 sps:$4 sm:$0xff]  }
  0xb0   :  { %3315 = vmatpush1.bf16.msra.mxu1 %v5593_v63  ;;  %3154 = vmatprep.subr.bf16.mxu0 %v5598_v0  ;;  %v5678_v63 = vld [vmem:[%s8243_s1 + $0x334] ss:$40 sps:$4 sm:$0xff]   ;;  %v5673_v0 = vld [vmem:[%s8243_s1 + $0x158] ss:$40 sps:$4 sm:$0xff]  }
  0xb1   :  { %3316 = vmatprep.subr.bf16.mxu1 %v5601_v1  ;;  %v5676_v1 = vld [vmem:[%s8243_s1 + $0x330] ss:$40 sps:$4 sm:$0xff]  }
  0xb3   :  { %3155 = vmatpush1.bf16.msra.mxu0 %v5596_v3  ;;  %v5681_v3 = vld [vmem:[%s8243_s1 + $0x1ac] ss:$40 sps:$4 sm:$0xff]  }
  0xb4   :  { %3317 = vmatpush1.bf16.msra.mxu1 %v5599_v4  ;;  %3156 = vmatprep.subr.bf16.mxu0 %v5604_v5  ;;  %v5684_v4 = vld [vmem:[%s8243_s1 + $0x384] ss:$40 sps:$4 sm:$0xff]   ;;  %v5679_v5 = vld [vmem:[%s8243_s1 + $0x1a8] ss:$40 sps:$4 sm:$0xff]  }
  0xb5   :  { %3318 = vmatprep.subr.bf16.mxu1 %v5607_v6  ;;  %v5682_v6 = vld [vmem:[%s8243_s1 + $0x380] ss:$40 sps:$4 sm:$0xff]  }
  0xb7   :  { %3157 = vmatpush1.bf16.msra.mxu0 %v5602_v7  ;;  %v5687_v7 = vld [vmem:[%s8243_s1 + $0x1fc] ss:$40 sps:$4 sm:$0xff]  }
  0xb8   :  { %3319 = vmatpush1.bf16.msra.mxu1 %v5605_v9  ;;  %3158 = vmatprep.subr.bf16.mxu0 %v5610_v10  ;;  %v5690_v9 = vld [vmem:[%s8243_s1 + $0x3d4] ss:$40 sps:$4 sm:$0xff]   ;;  %v5685_v10 = vld [vmem:[%s8243_s1 + $0x1f8] ss:$40 sps:$4 sm:$0xff]  }
  0xb9   :  { %3320 = vmatprep.subr.bf16.mxu1 %v5613_v11  ;;  %v5688_v11 = vld [vmem:[%s8243_s1 + $0x3d0] ss:$40 sps:$4 sm:$0xff]  }
  0xbb   :  { %3159 = vmatpush1.bf16.msra.mxu0 %v5608_v12  ;;  %v5693_v12 = vld [vmem:[%s8243_s1 + $0x24c] ss:$40 sps:$4 sm:$0xff]  }
  0xbc   :  { %3321 = vmatpush1.bf16.msra.mxu1 %v5611_v13  ;;  %3160 = vmatprep.subr.bf16.mxu0 %v5616_v14  ;;  %v5696_v13 = vld [vmem:[%s8243_s1 + $0x424] ss:$40 sps:$4 sm:$0xff]   ;;  %v5691_v14 = vld [vmem:[%s8243_s1 + $0x248] ss:$40 sps:$4 sm:$0xff]  }
  0xbd   :  { %3322 = vmatprep.subr.bf16.mxu1 %v5619_v16  ;;  %v5694_v16 = vld [vmem:[%s8243_s1 + $0x420] ss:$40 sps:$4 sm:$0xff]  }
  0xbf   :  { %3161 = vmatpush1.bf16.msra.mxu0 %v5614_v17  ;;  %v5699_v17 = vld [vmem:[%s8243_s1 + $0x29c] ss:$40 sps:$4 sm:$0xff]  }
  0xc0   :  { %3323 = vmatpush1.bf16.msra.mxu1 %v5617_v20  ;;  %3376 = vmatprep.subr.bf16.mxu0 %v5627_v22  ;;  %v5702_v20 = vld [vmem:[%s8243_s1 + $0x474] ss:$40 sps:$4 sm:$0xff]   ;;  %v5700_v22 = vld [vmem:[%s8243_s1 + $0x470] ss:$40 sps:$4 sm:$0xff]  }
  0xc1   :  { %3324 = vmatprep.subr.bf16.mxu1 %v5624_v21  ;;  %v5697_v21 = vld [vmem:[%s8243_s1 + $0x298] ss:$40 sps:$4 sm:$0xff]  }
  0xc2   :  { %3163 = vmatmul.mubr.bf16.vlgmr.msra.gmra.mrb[0].mxu0 %v6759_v23 }
  0xc3   :  { %3377 = vmatpush1.bf16.msra.mxu0 %v5625_v25  ;;  %3408 = vmatprep.mubr.bf16.mxu0 %v6286_v52  ;;  %v5708_v25 = vld [vmem:[%s8243_s1 + $0x4c4] ss:$40 sps:$4 sm:$0xff]  }
  0xc4   :  { %3325 = vmatpush1.bf16.msra.mxu1 %v5622_v24  ;;  %3378 = vmatprep.subr.bf16.mxu0 %v5630_v26  ;;  %v5705_v24 = vld [vmem:[%s8243_s1 + $0x2ec] ss:$40 sps:$4 sm:$0xff]   ;;  %v5703_v26 = vld [vmem:[%s8243_s1 + $0x2e8] ss:$40 sps:$4 sm:$0xff]  }
  0xc5   :  { %3335 = vmatprep.subr.bf16.mxu1 %v5636_v18  ;;  %v5706_v18 = vld [vmem:[%s8243_s1 + $0x4c0] ss:$40 sps:$4 sm:$0xff]  }
  0xc7   :  { %3327 = vmatmul.mubr.bf16.vlgmr.msra.gmra.mrb[4].mxu1 %v6759_v23  ;;  %3379 = vmatpush1.bf16.msra.mxu0 %v5628_v27  ;;  %v5711_v27 = vld [vmem:[%s8243_s1 + $0x33c] ss:$40 sps:$4 sm:$0xff]  }
  0xc8   :  { %3336 = vmatpush1.bf16.msra.mxu1 %v5634_v28  ;;  %3380 = vmatprep.subr.bf16.mxu0 %v5633_v29  ;;  %v5714_v28 = vld [vmem:[%s8243_s1 + $0x514] ss:$40 sps:$4 sm:$0xff]   ;;  %v5709_v29 = vld [vmem:[%s8243_s1 + $0x338] ss:$40 sps:$4 sm:$0xff]  }
  0xc9   :  { %3367 = vmatprep.mubr.bf16.mxu1 %v6099_v2  ;;  %3499 = vmatprep.subr.bf16.mxu1 %v5645_v30  ;;  %v5712_v30 = vld [vmem:[%s8243_s1 + $0x510] ss:$40 sps:$4 sm:$0xff]  }
  0xcb   :  { %3381 = vmatpush1.bf16.msra.mxu0 %v5631_v31  ;;  %v5717_v31 = vld [vmem:[%s8243_s1 + $0x38c] ss:$40 sps:$4 sm:$0xff]  }
  0xcc   :  { %3382 = vmatprep.subr.bf16.mxu0 %v5639_v32  ;;  %v5720_v32 = vld [vmem:[%s8243_s1 + $0x564] ss:$40 sps:$4 sm:$0xff]  }
  0xcf   :  { %3383 = vmatpush1.bf16.msra.mxu0 %v5637_v33  ;;  %v5715_v33 = vld [vmem:[%s8243_s1 + $0x388] ss:$40 sps:$4 sm:$0xff]  }
  0xd0   :  { %3384 = vmatprep.subr.bf16.mxu0 %v5642_v34  ;;  %v5718_v34 = vld [vmem:[%s8243_s1 + $0x560] ss:$40 sps:$4 sm:$0xff]  }
  0xd3   :  { %4921 = vmatmul.mubr.msk.bf16.vlgmr.msra.gmra.mrb[4].mxu1 %vm3044_vm0, %v6073_v40  ;;  %3385 = vmatpush1.bf16.msra.mxu0 %v5640_v36  ;;  %v5723_v36 = vld [vmem:[%s8243_s1 + $0x3dc] ss:$40 sps:$4 sm:$0xff]  }
  0xd4   :  { %3500 = vmatpush1.bf16.msra.mxu1 %v5643_v37  ;;  %3386 = vmatprep.subr.bf16.mxu0 %v5648_v38  ;;  %v5726_v37 = vld [vmem:[%s8243_s1 + $0x5b4] ss:$40 sps:$4 sm:$0xff]   ;;  %v5721_v38 = vld [vmem:[%s8243_s1 + $0x3d8] ss:$40 sps:$4 sm:$0xff]  }
  0xd5   :  { %3531 = vmatprep.mubr.bf16.mxu1 %v6099_v2  ;;  %3540 = vmatprep.subr.bf16.mxu1 %v5651_v39  ;;  %v5724_v39 = vld [vmem:[%s8243_s1 + $0x5b0] ss:$40 sps:$4 sm:$0xff]  }
  0xd7   :  { %3387 = vmatpush1.bf16.msra.mxu0 %v5646_v41  ;;  %v5732_v41 = vld [vmem:[%s8243_s1 + $0x604] ss:$40 sps:$4 sm:$0xff]  }
  0xd8   :  { %3388 = vmatprep.subr.bf16.mxu0 %v5654_v42  ;;  %v5727_v42 = vld [vmem:[%s8243_s1 + $0x428] ss:$40 sps:$4 sm:$0xff]  }
  0xda   :  { %v6836_v47 = vpop.f32.mrb[0].mxu1 }
  0xdb   :  { %4922 = vmatmul.mubr.msk.bf16.vlgmr.msra.gmra.mrb[8].mxu1 %vm3044_vm0, %v6073_v40  ;;  %v6842_v49 = vpop.f32.mrb[1].mxu1  ;;  %3389 = vmatpush1.bf16.msra.mxu0 %v5652_v44  ;;  %v5729_v40 = vld [vmem:[%s8243_s1 + $0x42c] ss:$40 sps:$4 sm:$0xff]   ;;  %v5735_v44 = vld [vmem:[%s8243_s1 + $0x47c] ss:$40 sps:$4 sm:$0xff]  }
  0xdc   :  { %3541 = vmatpush1.bf16.msra.mxu1 %v5649_v43  ;;  %v3209_v51 = vpop.f32.mrb[2].mxu1  ;;  %3390 = vmatprep.subr.bf16.mxu0 %v5660_v46  ;;  %v5730_v43 = vld [vmem:[%s8243_s1 + $0x600] ss:$40 sps:$4 sm:$0xff]  }
  0xdd   :  { %3542 = vmatprep.subr.bf16.mxu1 %v5657_v45  ;;  %v3210_v55 = vpop.f32.mrb[3].mxu1  ;;  %3572 = vmatprep.mubr.bf16.mxu1 %v6286_v52  ;;  %v5738_v45 = vld [vmem:[%s8243_s1 + $0x654] ss:$40 sps:$4 sm:$0xff]   ;;  %v5733_v46 = vld [vmem:[%s8243_s1 + $0x478] ss:$40 sps:$4 sm:$0xff]  }
  0xde   :  { %v5744_v51 = vld [vmem:[%s8243_s1 + $0x6a4] ss:$40 sps:$4 sm:$0xff]  }
  0xdf   :  { %3391 = vmatpush1.bf16.msra.mxu0 %v5658_v50  ;;  %v5741_v50 = vld [vmem:[%s8243_s1 + $0x4cc] ss:$40 sps:$4 sm:$0xff]   ;;  %v5747_v55 = vld [vmem:[%s8243_s1 + $0x51c] ss:$40 sps:$4 sm:$0xff]  }
  0xe0   :  { %3543 = vmatpush1.bf16.msra.mxu1 %v5655_v48  ;;  %3392 = vmatprep.subr.bf16.mxu0 %v5666_v54  ;;  %v5736_v48 = vld [vmem:[%s8243_s1 + $0x650] ss:$40 sps:$4 sm:$0xff]   ;;  %v5742_v54 = vld [vmem:[%s8243_s1 + $0x6a0] ss:$40 sps:$4 sm:$0xff]  }
  0xe1   :  { %3544 = vmatprep.subr.bf16.mxu1 %v5663_v53  ;;  %v5739_v53 = vld [vmem:[%s8243_s1 + $0x4c8] ss:$40 sps:$4 sm:$0xff]  }
  0xe3   :  { %3393 = vmatpush1.bf16.msra.mxu0 %v5664_v57  ;;  %v5745_v57 = vld [vmem:[%s8243_s1 + $0x518] ss:$40 sps:$4 sm:$0xff]  }
  0xe4   :  { %3545 = vmatpush1.bf16.msra.mxu1 %v5661_v56  ;;  %3394 = vmatprep.subr.bf16.mxu0 %v5672_v59  ;;  %v5750_v56 = vld [vmem:[%s8243_s1 + $0x6f4] ss:$40 sps:$4 sm:$0xff]  }
  0xe5   :  { %3546 = vmatprep.subr.bf16.mxu1 %v5669_v58  ;;  %v5748_v58 = vld [vmem:[%s8243_s1 + $0x6f0] ss:$40 sps:$4 sm:$0xff]   ;;  %v5753_v59 = vld [vmem:[%s8243_s1 + $0x56c] ss:$40 sps:$4 sm:$0xff]  }
  0xe7   :  { %3395 = vmatpush1.bf16.msra.mxu0 %v5670_v61  ;;  %v5751_v61 = vld [vmem:[%s8243_s1 + $0x568] ss:$40 sps:$4 sm:$0xff]  }
  0xe8   :  { %3547 = vmatpush1.bf16.msra.mxu1 %v5667_v60  ;;  %3396 = vmatprep.subr.bf16.mxu0 %v5678_v63  ;;  %v5756_v60 = vld [vmem:[%s8243_s1 + $0x744] ss:$40 sps:$4 sm:$0xff]  }
  0xe9   :  { %3548 = vmatprep.subr.bf16.mxu1 %v5675_v62  ;;  %v5754_v62 = vld [vmem:[%s8243_s1 + $0x740] ss:$40 sps:$4 sm:$0xff]   ;;  %v5759_v63 = vld [vmem:[%s8243_s1 + $0x5bc] ss:$40 sps:$4 sm:$0xff]  }
  0xeb   :  { %3397 = vmatpush1.bf16.msra.mxu0 %v5676_v1  ;;  %v5757_v1 = vld [vmem:[%s8243_s1 + $0x5b8] ss:$40 sps:$4 sm:$0xff]  }
  0xec   :  { %3549 = vmatpush1.bf16.msra.mxu1 %v5673_v0  ;;  %3398 = vmatprep.subr.bf16.mxu0 %v5684_v4  ;;  %v5762_v0 = vld [vmem:[%s8243_s1 + $0x794] ss:$40 sps:$4 sm:$0xff]  }
  0xed   :  { %3550 = vmatprep.subr.bf16.mxu1 %v5681_v3  ;;  %v5760_v3 = vld [vmem:[%s8243_s1 + $0x790] ss:$40 sps:$4 sm:$0xff]   ;;  %v5765_v4 = vld [vmem:[%s8243_s1 + $0x60c] ss:$40 sps:$4 sm:$0xff]  }
  0xef   :  { %3399 = vmatpush1.bf16.msra.mxu0 %v5682_v6  ;;  %v5763_v6 = vld [vmem:[%s8243_s1 + $0x608] ss:$40 sps:$4 sm:$0xff]  }
  0xf0   :  { %3551 = vmatpush1.bf16.msra.mxu1 %v5679_v5  ;;  %3400 = vmatprep.subr.bf16.mxu0 %v5690_v9  ;;  %v5768_v5 = vld [vmem:[%s8243_s1 + $0x7e4] ss:$40 sps:$4 sm:$0xff]  }
  0xf1   :  { %3552 = vmatprep.subr.bf16.mxu1 %v5687_v7  ;;  %v5766_v7 = vld [vmem:[%s8243_s1 + $0x7e0] ss:$40 sps:$4 sm:$0xff]   ;;  %v5771_v9 = vld [vmem:[%s8243_s1 + $0x65c] ss:$40 sps:$4 sm:$0xff]  }
  0xf3   :  { %3401 = vmatpush1.bf16.msra.mxu0 %v5688_v11  ;;  %v5769_v11 = vld [vmem:[%s8243_s1 + $0x658] ss:$40 sps:$4 sm:$0xff]  }
  0xf4   :  { %3553 = vmatpush1.bf16.msra.mxu1 %v5685_v10  ;;  %3402 = vmatprep.subr.bf16.mxu0 %v5696_v13  ;;  %v5774_v10 = vld [vmem:[%s8243_s1 + $0x834] ss:$40 sps:$4 sm:$0xff]  }
  0xf5   :  { %3554 = vmatprep.subr.bf16.mxu1 %v5693_v12  ;;  %v5772_v12 = vld [vmem:[%s8243_s1 + $0x830] ss:$40 sps:$4 sm:$0xff]   ;;  %v5777_v13 = vld [vmem:[%s8243_s1 + $0x6ac] ss:$40 sps:$4 sm:$0xff]  }
  0xf7   :  { %3403 = vmatpush1.bf16.msra.mxu0 %v5694_v16  ;;  %v5775_v16 = vld [vmem:[%s8243_s1 + $0x6a8] ss:$40 sps:$4 sm:$0xff]  }
  0xf8   :  { %3555 = vmatpush1.bf16.msra.mxu1 %v5691_v14  ;;  %3404 = vmatprep.subr.bf16.mxu0 %v5702_v20  ;;  %v5780_v14 = vld [vmem:[%s8243_s1 + $0x884] ss:$40 sps:$4 sm:$0xff]  }
  0xf9   :  { %3556 = vmatprep.subr.bf16.mxu1 %v5699_v17  ;;  %v5778_v17 = vld [vmem:[%s8243_s1 + $0x880] ss:$40 sps:$4 sm:$0xff]   ;;  %v5783_v20 = vld [vmem:[%s8243_s1 + $0x6fc] ss:$40 sps:$4 sm:$0xff]  }
  0xfb   :  { %3405 = vmatpush1.bf16.msra.mxu0 %v5700_v22  ;;  %v5781_v22 = vld [vmem:[%s8243_s1 + $0x6f8] ss:$40 sps:$4 sm:$0xff]  }
  0xfc   :  { %3557 = vmatpush1.bf16.msra.mxu1 %v5697_v21  ;;  %3406 = vmatprep.subr.bf16.mxu0 %v5708_v25  ;;  %v5786_v21 = vld [vmem:[%s8243_s1 + $0x8d4] ss:$40 sps:$4 sm:$0xff]  }
  0xfd   :  { %3558 = vmatprep.subr.bf16.mxu1 %v5705_v24  ;;  %v5784_v24 = vld [vmem:[%s8243_s1 + $0x8d0] ss:$40 sps:$4 sm:$0xff]   ;;  %v5789_v25 = vld [vmem:[%s8243_s1 + $0x74c] ss:$40 sps:$4 sm:$0xff]  }
  0xff   :  { %3407 = vmatpush1.bf16.msra.mxu0 %v5706_v18 }
 0x100   :  { %3559 = vmatpush1.bf16.msra.mxu1 %v5703_v26  ;;  %3417 = vmatprep.subr.bf16.mxu0 %v5714_v28  ;;  %v5792_v26 = vld [vmem:[%s8243_s1 + $0x924] ss:$40 sps:$4 sm:$0xff]  }
 0x101   :  { %3560 = vmatprep.subr.bf16.mxu1 %v5711_v27 }
 0x102   :  { %3409 = vmatmul.mubr.bf16.vlgmr.msra.gmra.mrb[4].mxu0 %v6344_v8 }
 0x103   :  { %3418 = vmatpush1.bf16.msra.mxu0 %v5712_v30  ;;  %3449 = vmatprep.mubr.bf16.mxu0 %v6430_v35 }
 0x104   :  { %3561 = vmatpush1.bf16.msra.mxu1 %v5709_v29  ;;  %3419 = vmatprep.subr.bf16.mxu0 %v5720_v32 }
 0x105   :  { %3562 = vmatprep.subr.bf16.mxu1 %v5717_v31 }
 0x107   :  { %3420 = vmatpush1.bf16.msra.mxu0 %v5718_v34 }
 0x108   :  { %3563 = vmatpush1.bf16.msra.mxu1 %v5715_v33  ;;  %3421 = vmatprep.subr.bf16.mxu0 %v5726_v37 }
 0x109   :  { %3564 = vmatprep.subr.bf16.mxu1 %v5723_v36 }
 0x10b   :  { %3422 = vmatpush1.bf16.msra.mxu0 %v5724_v39 }
 0x10c   :  { %3565 = vmatpush1.bf16.msra.mxu1 %v5721_v38  ;;  %3423 = vmatprep.subr.bf16.mxu0 %v5732_v41 }
 0x10d   :  { %3566 = vmatprep.subr.bf16.mxu1 %v5729_v40 }
 0x10f   :  { %3424 = vmatpush1.bf16.msra.mxu0 %v5730_v43 }
 0x110   :  { %3567 = vmatpush1.bf16.msra.mxu1 %v5727_v42  ;;  %3425 = vmatprep.subr.bf16.mxu0 %v5738_v45 }
 0x111   :  { %3568 = vmatprep.subr.bf16.mxu1 %v5735_v44 }
 0x113   :  { %3426 = vmatpush1.bf16.msra.mxu0 %v5736_v48 }
 0x114   :  { %3569 = vmatpush1.bf16.msra.mxu1 %v5733_v46  ;;  %3427 = vmatprep.subr.bf16.mxu0 %v5744_v51 }
 0x115   :  { %3570 = vmatprep.subr.bf16.mxu1 %v5741_v50 }
 0x117   :  { %3428 = vmatpush1.bf16.msra.mxu0 %v5742_v54 }
 0x118   :  { %3571 = vmatpush1.bf16.msra.mxu1 %v5739_v53  ;;  %3429 = vmatprep.subr.bf16.mxu0 %v5750_v56 }
 0x119   :  { %3581 = vmatprep.subr.bf16.mxu1 %v5747_v55 }
 0x11b   :  { %3573 = vmatmul.mubr.bf16.vlgmr.msra.gmra.mrb[12].mxu1 %v6344_v8  ;;  %3430 = vmatpush1.bf16.msra.mxu0 %v5748_v58 }
 0x11c   :  { %3582 = vmatpush1.bf16.msra.mxu1 %v5745_v57  ;;  %3431 = vmatprep.subr.bf16.mxu0 %v5756_v60 }
 0x11d   :  { %3583 = vmatprep.subr.bf16.mxu1 %v5753_v59  ;;  %3613 = vmatprep.mubr.bf16.mxu1 %v6430_v35 }
 0x11f   :  { %3432 = vmatpush1.bf16.msra.mxu0 %v5754_v62 }
 0x120   :  { %3584 = vmatpush1.bf16.msra.mxu1 %v5751_v61  ;;  %3433 = vmatprep.subr.bf16.mxu0 %v5762_v0 }
 0x121   :  { %3585 = vmatprep.subr.bf16.mxu1 %v5759_v63 }
 0x123   :  { %3434 = vmatpush1.bf16.msra.mxu0 %v5760_v3 }
 0x124   :  { %3586 = vmatpush1.bf16.msra.mxu1 %v5757_v1  ;;  %3435 = vmatprep.subr.bf16.mxu0 %v5768_v5 }
 0x125   :  { %3587 = vmatprep.subr.bf16.mxu1 %v5765_v4 }
 0x127   :  { %3436 = vmatpush1.bf16.msra.mxu0 %v5766_v7 }
 0x128   :  { %3588 = vmatpush1.bf16.msra.mxu1 %v5763_v6  ;;  %3437 = vmatprep.subr.bf16.mxu0 %v5774_v10 }
 0x129   :  { %3589 = vmatprep.subr.bf16.mxu1 %v5771_v9 }
 0x12b   :  { %3438 = vmatpush1.bf16.msra.mxu0 %v5772_v12 }
 0x12c   :  { %3590 = vmatpush1.bf16.msra.mxu1 %v5769_v11  ;;  %3439 = vmatprep.subr.bf16.mxu0 %v5780_v14 }
 0x12d   :  { %3591 = vmatprep.subr.bf16.mxu1 %v5777_v13 }
 0x12f   :  { %3440 = vmatpush1.bf16.msra.mxu0 %v5778_v17 }
 0x130   :  { %3592 = vmatpush1.bf16.msra.mxu1 %v5775_v16  ;;  %3441 = vmatprep.subr.bf16.mxu0 %v5786_v21 }
 0x131   :  { %3593 = vmatprep.subr.bf16.mxu1 %v5783_v20 }
 0x132   :  { %10 = vsyncpa [#allocation3], 0  ;;  %v5787_v18 = vld [vmem:[%s8243_s1 + $0x748] ss:$40 sps:$4 sm:$0xff]   ;;  %v5795_v28 = vld [vmem:[%s8243_s1 + $0x79c] ss:$40 sps:$4 sm:$0xff]  }
 0x133   :  { %3442 = vmatpush1.bf16.msra.mxu0 %v5784_v24  ;;  %v5790_v27 = vld [vmem:[%s8243_s1 + $0x920] ss:$40 sps:$4 sm:$0xff]   ;;  %v5798_v29 = vld [vmem:[%s8243_s1 + $0x974] ss:$40 sps:$4 sm:$0xff]   ;;  %v5796_v31 = vld [vmem:[%s8243_s1 + $0x970] ss:$40 sps:$4 sm:$0xff]  }
 0x134   :  { %3594 = vmatpush1.bf16.msra.mxu1 %v5781_v22  ;;  %3443 = vmatprep.subr.bf16.mxu0 %v5792_v26  ;;  %v5793_v30 = vld [vmem:[%s8243_s1 + $0x798] ss:$40 sps:$4 sm:$0xff]   ;;  %v5801_v32 = vld [vmem:[%s8243_s1 + $0x7ec] ss:$40 sps:$4 sm:$0xff]   ;;  %v5799_v34 = vld [vmem:[%s8243_s1 + $0x7e8] ss:$40 sps:$4 sm:$0xff]  }
 0x135   :  { %3595 = vmatprep.subr.bf16.mxu1 %v5789_v25  ;;  %v5804_v33 = vld [vmem:[%s8243_s1 + $0x9c4] ss:$40 sps:$4 sm:$0xff]   ;;  %v5802_v36 = vld [vmem:[%s8243_s1 + $0x9c0] ss:$40 sps:$4 sm:$0xff]   ;;  %v5810_v38 = vld [vmem:[%s8243_s1 + $0xa14] ss:$40 sps:$4 sm:$0xff]  }
 0x136   :  { %v5807_v37 = vld [vmem:[%s8243_s1 + $0x83c] ss:$40 sps:$4 sm:$0xff]   ;;  %v5805_v39 = vld [vmem:[%s8243_s1 + $0x838] ss:$40 sps:$4 sm:$0xff]   ;;  %v5813_v41 = vld [vmem:[%s8243_s1 + $0x88c] ss:$40 sps:$4 sm:$0xff]  }
 0x137   :  { %3444 = vmatpush1.bf16.msra.mxu0 %v5790_v27  ;;  %v5808_v40 = vld [vmem:[%s8243_s1 + $0xa10] ss:$40 sps:$4 sm:$0xff]   ;;  %v5816_v42 = vld [vmem:[%s8243_s1 + $0xa64] ss:$40 sps:$4 sm:$0xff]   ;;  %v5814_v44 = vld [vmem:[%s8243_s1 + $0xa60] ss:$40 sps:$4 sm:$0xff]  }
 0x138   :  { %3596 = vmatpush1.bf16.msra.mxu1 %v5787_v18  ;;  %3445 = vmatprep.subr.bf16.mxu0 %v5798_v29  ;;  %v5811_v43 = vld [vmem:[%s8243_s1 + $0x888] ss:$40 sps:$4 sm:$0xff]   ;;  %v5819_v45 = vld [vmem:[%s8243_s1 + $0x8dc] ss:$40 sps:$4 sm:$0xff]   ;;  %v5817_v48 = vld [vmem:[%s8243_s1 + $0x8d8] ss:$40 sps:$4 sm:$0xff]  }
 0x139   :  { %3597 = vmatprep.subr.bf16.mxu1 %v5795_v28  ;;  %v5822_v46 = vld [vmem:[%s8243_s1 + $0xab4] ss:$40 sps:$4 sm:$0xff]   ;;  %v5820_v50 = vld [vmem:[%s8243_s1 + $0xab0] ss:$40 sps:$4 sm:$0xff]   ;;  %v5828_v53 = vld [vmem:[%s8243_s1 + $0xb04] ss:$40 sps:$4 sm:$0xff]  }
 0x13a   :  { %v5825_v51 = vld [vmem:[%s8243_s1 + $0x92c] ss:$40 sps:$4 sm:$0xff]   ;;  %v5823_v54 = vld [vmem:[%s8243_s1 + $0x928] ss:$40 sps:$4 sm:$0xff]   ;;  %v5831_v56 = vld [vmem:[%s8243_s1 + $0x97c] ss:$40 sps:$4 sm:$0xff]  }
 0x13b   :  { %3446 = vmatpush1.bf16.msra.mxu0 %v5796_v31  ;;  %v5826_v55 = vld [vmem:[%s8243_s1 + $0xb00] ss:$40 sps:$4 sm:$0xff]   ;;  %v5834_v57 = vld [vmem:[%s8243_s1 + $0xb54] ss:$40 sps:$4 sm:$0xff]   ;;  %v5832_v59 = vld [vmem:[%s8243_s1 + $0xb50] ss:$40 sps:$4 sm:$0xff]  }
 0x13c   :  { %3598 = vmatpush1.bf16.msra.mxu1 %v5793_v30  ;;  %3447 = vmatprep.subr.bf16.mxu0 %v5804_v33  ;;  %v5829_v58 = vld [vmem:[%s8243_s1 + $0x978] ss:$40 sps:$4 sm:$0xff]   ;;  %v5837_v60 = vld [vmem:[%s8243_s1 + $0x9cc] ss:$40 sps:$4 sm:$0xff]   ;;  %v5835_v62 = vld [vmem:[%s8243_s1 + $0x9c8] ss:$40 sps:$4 sm:$0xff]  }
 0x13d   :  { %3599 = vmatprep.subr.bf16.mxu1 %v5801_v32  ;;  %v5840_v61 = vld [vmem:[%s8243_s1 + $0xba4] ss:$40 sps:$4 sm:$0xff]   ;;  %v5838_v63 = vld [vmem:[%s8243_s1 + $0xba0] ss:$40 sps:$4 sm:$0xff]   ;;  %v5846_v1 = vld [vmem:[%s8243_s1 + $0xbf4] ss:$40 sps:$4 sm:$0xff]  }
 0x13e   :  { %v5843_v0 = vld [vmem:[%s8243_s1 + $0xa1c] ss:$40 sps:$4 sm:$0xff]   ;;  %v5841_v3 = vld [vmem:[%s8243_s1 + $0xa18] ss:$40 sps:$4 sm:$0xff]   ;;  %v5849_v5 = vld [vmem:[%s8243_s1 + $0xa6c] ss:$40 sps:$4 sm:$0xff]  }
 0x13f   :  { %3448 = vmatpush1.bf16.msra.mxu0 %v5802_v36  ;;  %v5844_v4 = vld [vmem:[%s8243_s1 + $0xbf0] ss:$40 sps:$4 sm:$0xff]   ;;  %v5852_v6 = vld [vmem:[%s8243_s1 + $0xc44] ss:$40 sps:$4 sm:$0xff]   ;;  %v5850_v9 = vld [vmem:[%s8243_s1 + $0xc40] ss:$40 sps:$4 sm:$0xff]  }
 0x140   :  { %3600 = vmatpush1.bf16.msra.mxu1 %v5799_v34  ;;  %3458 = vmatprep.subr.bf16.mxu0 %v5810_v38  ;;  %v5847_v7 = vld [vmem:[%s8243_s1 + $0xa68] ss:$40 sps:$4 sm:$0xff]   ;;  %v5855_v10 = vld [vmem:[%s8243_s1 + $0xabc] ss:$40 sps:$4 sm:$0xff]   ;;  %v5853_v12 = vld [vmem:[%s8243_s1 + $0xab8] ss:$40 sps:$4 sm:$0xff]  }
 0x141   :  { %3601 = vmatprep.subr.bf16.mxu1 %v5807_v37  ;;  %v5858_v11 = vld [vmem:[%s8243_s1 + $0xc94] ss:$40 sps:$4 sm:$0xff]   ;;  %v5856_v13 = vld [vmem:[%s8243_s1 + $0xc90] ss:$40 sps:$4 sm:$0xff]   ;;  %v5864_v16 = vld [vmem:[%s8243_s1 + $0xce4] ss:$40 sps:$4 sm:$0xff]  }
 0x142   :  { %3450 = vmatmul.mubr.bf16.vlgmr.msra.gmra.mrb[4].mxu0 %v6556_v15  ;;  %v5861_v14 = vld [vmem:[%s8243_s1 + $0xb0c] ss:$40 sps:$4 sm:$0xff]   ;;  %v5859_v17 = vld [vmem:[%s8243_s1 + $0xb08] ss:$40 sps:$4 sm:$0xff]   ;;  %v5867_v21 = vld [vmem:[%s8243_s1 + $0xb5c] ss:$40 sps:$4 sm:$0xff]  }
 0x143   :  { %3459 = vmatpush1.bf16.msra.mxu0 %v5808_v40  ;;  %3490 = vmatprep.mubr.bf16.mxu0 %v6571_v19  ;;  %v5862_v20 = vld [vmem:[%s8243_s1 + $0xce0] ss:$40 sps:$4 sm:$0xff]   ;;  %v5870_v22 = vld [vmem:[%s8243_s1 + $0xd34] ss:$40 sps:$4 sm:$0xff]   ;;  %v5868_v25 = vld [vmem:[%s8243_s1 + $0xd30] ss:$40 sps:$4 sm:$0xff]  }
 0x144   :  { %3602 = vmatpush1.bf16.msra.mxu1 %v5805_v39  ;;  %3460 = vmatprep.subr.bf16.mxu0 %v5816_v42  ;;  %v5865_v24 = vld [vmem:[%s8243_s1 + $0xb58] ss:$40 sps:$4 sm:$0xff]   ;;  %v5873_v26 = vld [vmem:[%s8243_s1 + $0xbac] ss:$40 sps:$4 sm:$0xff]   ;;  %v5871_v27 = vld [vmem:[%s8243_s1 + $0xba8] ss:$40 sps:$4 sm:$0xff]  }
 0x145   :  { %3603 = vmatprep.subr.bf16.mxu1 %v5813_v41  ;;  %v5876_v18 = vld [vmem:[%s8243_s1 + $0xd84] ss:$40 sps:$4 sm:$0xff]   ;;  %v5874_v28 = vld [vmem:[%s8243_s1 + $0xd80] ss:$40 sps:$4 sm:$0xff]   ;;  %v5882_v30 = vld [vmem:[%s8243_s1 + $0xdd4] ss:$40 sps:$4 sm:$0xff]  }
 0x146   :  { %v5879_v29 = vld [vmem:[%s8243_s1 + $0xbfc] ss:$40 sps:$4 sm:$0xff]   ;;  %v5877_v31 = vld [vmem:[%s8243_s1 + $0xbf8] ss:$40 sps:$4 sm:$0xff]   ;;  %v5885_v33 = vld [vmem:[%s8243_s1 + $0xc4c] ss:$40 sps:$4 sm:$0xff]  }
 0x147   :  { %3461 = vmatpush1.bf16.msra.mxu0 %v5814_v44  ;;  %v5880_v32 = vld [vmem:[%s8243_s1 + $0xdd0] ss:$40 sps:$4 sm:$0xff]   ;;  %v5888_v34 = vld [vmem:[%s8243_s1 + $0xe24] ss:$40 sps:$4 sm:$0xff]   ;;  %v5886_v37 = vld [vmem:[%s8243_s1 + $0xe20] ss:$40 sps:$4 sm:$0xff]  }
 0x148   :  { %3604 = vmatpush1.bf16.msra.mxu1 %v5811_v43  ;;  %3462 = vmatprep.subr.bf16.mxu0 %v5822_v46  ;;  %v5883_v36 = vld [vmem:[%s8243_s1 + $0xc48] ss:$40 sps:$4 sm:$0xff]   ;;  %v5891_v38 = vld [vmem:[%s8243_s1 + $0xc9c] ss:$40 sps:$4 sm:$0xff]   ;;  %v5889_v40 = vld [vmem:[%s8243_s1 + $0xc98] ss:$40 sps:$4 sm:$0xff]  }
 0x149   :  { %3605 = vmatprep.subr.bf16.mxu1 %v5819_v45  ;;  %v5894_v39 = vld [vmem:[%s8243_s1 + $0xe74] ss:$40 sps:$4 sm:$0xff]   ;;  %v5892_v41 = vld [vmem:[%s8243_s1 + $0xe70] ss:$40 sps:$4 sm:$0xff]   ;;  %v5900_v43 = vld [vmem:[%s8243_s1 + $0xec4] ss:$40 sps:$4 sm:$0xff]  }
 0x14a   :  { %v5897_v42 = vld [vmem:[%s8243_s1 + $0xcec] ss:$40 sps:$4 sm:$0xff]   ;;  %v5895_v44 = vld [vmem:[%s8243_s1 + $0xce8] ss:$40 sps:$4 sm:$0xff]   ;;  %v5903_v46 = vld [vmem:[%s8243_s1 + $0xd3c] ss:$40 sps:$4 sm:$0xff]  }
 0x14b   :  { %3463 = vmatpush1.bf16.msra.mxu0 %v5820_v50  ;;  %v5898_v45 = vld [vmem:[%s8243_s1 + $0xec0] ss:$40 sps:$4 sm:$0xff]   ;;  %vm4395_vm1 = vcmask 80896  }
 0x14c   :  { %3606 = vmatpush1.bf16.msra.mxu1 %v5817_v48  ;;  %3464 = vmatprep.subr.bf16.mxu0 %v5828_v53  ;;  %v5906_v48 = vld [vmem:[%s8243_s1 + $0x24] ss:$40 sps:$4 sm:$0xff]   ;;  %v5901_v50 = vld [vmem:[%s8243_s1 + $0xd38] ss:$40 sps:$4 sm:$0xff]  }
 0x14d   :  { %3607 = vmatprep.subr.bf16.mxu1 %v5825_v51  ;;  %v5904_v51 = vld [vmem:[%s8243_s1 + $0x20] ss:$40 sps:$4 sm:$0xff]   ;;  %v5909_v53 = vld [vmem:[%s8243_s1 + $0xd8c] ss:$40 sps:$4 sm:$0xff]  }
 0x14f   :  { %3465 = vmatpush1.bf16.msra.mxu0 %v5826_v55  ;;  %v5907_v55 = vld [vmem:[%s8243_s1 + $0xd88] ss:$40 sps:$4 sm:$0xff]  }
 0x150   :  { %3608 = vmatpush1.bf16.msra.mxu1 %v5823_v54  ;;  %3466 = vmatprep.subr.bf16.mxu0 %v5834_v57  ;;  %v5912_v54 = vld [vmem:[%s8243_s1 + $0x74] ss:$40 sps:$4 sm:$0xff]  }
 0x151   :  { %3609 = vmatprep.subr.bf16.mxu1 %v5831_v56  ;;  %v5910_v56 = vld [vmem:[%s8243_s1 + $0x70] ss:$40 sps:$4 sm:$0xff]   ;;  %v5915_v57 = vld [vmem:[%s8243_s1 + $0xddc] ss:$40 sps:$4 sm:$0xff]  }
 0x153   :  { %3467 = vmatpush1.bf16.msra.mxu0 %v5832_v59  ;;  %v520_v59 = vlaneseq }
 0x154   :  { %3610 = vmatpush1.bf16.msra.mxu1 %v5829_v58  ;;  %3468 = vmatprep.subr.bf16.mxu0 %v5840_v61  ;;  %v5918_v58 = vld [vmem:[%s8243_s1 + $0xc4] ss:$40 sps:$4 sm:$0xff]   ;;  %v5916_v61 = vld [vmem:[%s8243_s1 + $0xc0] ss:$40 sps:$4 sm:$0xff]  }
 0x155   :  { %3611 = vmatprep.subr.bf16.mxu1 %v5837_v60  ;;  %v5913_v60 = vld [vmem:[%s8243_s1 + $0xdd8] ss:$40 sps:$4 sm:$0xff]  }
 0x157   :  { %3469 = vmatpush1.bf16.msra.mxu0 %v5838_v63  ;;  %v7380_v63 = vshrl.u32 %v520_v59, 7  ;;  %v3880_v59 = vld [vmem:[%s8245_s3 + $0x10] sm:$0xff] }
 0x158   :  { %3612 = vmatpush1.bf16.msra.mxu1 %v5835_v62  ;;  %3470 = vmatprep.subr.bf16.mxu0 %v5846_v1  ;;  %v5921_v62 = vld [vmem:[%s8243_s1 + $0xe2c] ss:$40 sps:$4 sm:$0xff]   ;;  %v5922_v1 = vld [vmem:[%s8243_s1 + $0x110] ss:$40 sps:$4 sm:$0xff]  }
 0x159   :  { %3622 = vmatprep.subr.bf16.mxu1 %v5843_v0  ;;  %v5919_v0 = vld [vmem:[%s8243_s1 + $0xe28] ss:$40 sps:$4 sm:$0xff]  }
 0x15b   :  { %3614 = vmatmul.mubr.bf16.vlgmr.msra.gmra.mrb[12].mxu1 %v6556_v15  ;;  %3471 = vmatpush1.bf16.msra.mxu0 %v5844_v4  ;;  %v5930_v4 = vld [vmem:[%s8243_s1 + $0x164] ss:$40 sps:$4 sm:$0xff]  }
 0x15c   :  { %3623 = vmatpush1.bf16.msra.mxu1 %v5841_v3  ;;  %3472 = vmatprep.subr.bf16.mxu0 %v5852_v6  ;;  %v5927_v3 = vld [vmem:[%s8243_s1 + $0xe7c] ss:$40 sps:$4 sm:$0xff]   ;;  %v5925_v6 = vld [vmem:[%s8243_s1 + $0xe78] ss:$40 sps:$4 sm:$0xff]  }
 0x15d   :  { %3624 = vmatprep.subr.bf16.mxu1 %v5849_v5  ;;  %3654 = vmatprep.mubr.bf16.mxu1 %v6571_v19  ;;  %v522_v5 = vsub.s32 0, %v7380_v63 }
 0x15f   :  { %3473 = vmatpush1.bf16.msra.mxu0 %v5850_v9  ;;  %v7404_v9 = vld [vmem:[%s8244_s2] sm:$0xff] }
 0x160   :  { %3625 = vmatpush1.bf16.msra.mxu1 %v5847_v7  ;;  %3474 = vmatprep.subr.bf16.mxu0 %v5858_v11  ;;  %v5928_v7 = vld [vmem:[%s8243_s1 + $0x160] ss:$40 sps:$4 sm:$0xff]   ;;  %v5933_v11 = vld [vmem:[%s8243_s1 + $0xecc] ss:$40 sps:$4 sm:$0xff]  }
 0x161   :  { %3626 = vmatprep.subr.bf16.mxu1 %v5855_v10  ;;  %v526_v10 = vsub.s32 1, %v7380_v63 }
 0x163   :  { %3475 = vmatpush1.bf16.msra.mxu0 %v5856_v13  ;;  %v523_v13 = vrot.slane %v7404_v9, %v522_v5 }
 0x164   :  { %3627 = vmatpush1.bf16.msra.mxu1 %v5853_v12  ;;  %3476 = vmatprep.subr.bf16.mxu0 %v5864_v16  ;;  %v5936_v12 = vld [vmem:[%s8243_s1 + $0x1b4] ss:$40 sps:$4 sm:$0xff]   ;;  %v527_v16 = vrot.slane %v7404_v9, %v526_v10 }
 0x165   :  { %3628 = vmatprep.subr.bf16.mxu1 %v5861_v14  ;;  %v5931_v14 = vld [vmem:[%s8243_s1 + $0xec8] ss:$40 sps:$4 sm:$0xff]  }
 0x167   :  { %3477 = vmatpush1.bf16.msra.mxu0 %v5862_v20  ;;  %v5939_v20 = vld [vmem:[%s8243_s1 + $0x204] ss:$40 sps:$4 sm:$0xff]  }
 0x168   :  { %3629 = vmatpush1.bf16.msra.mxu1 %v5859_v17  ;;  %3478 = vmatprep.subr.bf16.mxu0 %v5870_v22  ;;  %v5934_v17 = vld [vmem:[%s8243_s1 + $0x1b0] ss:$40 sps:$4 sm:$0xff]  }
 0x169   :  { %3630 = vmatprep.subr.bf16.mxu1 %v5867_v21  ;;  %v5945_v21 = vld [vmem:[%s8243_s1 + $0xf1c] ss:$40 sps:$4 sm:$0xff]  }
 0x16b   :  { %3479 = vmatpush1.bf16.msra.mxu0 %v5868_v25 }
 0x16c   :  { %3631 = vmatpush1.bf16.msra.mxu1 %v5865_v24  ;;  %3480 = vmatprep.subr.bf16.mxu0 %v5876_v18 }
 0x16d   :  { %3632 = vmatprep.subr.bf16.mxu1 %v5873_v26 }
 0x16f   :  { %3481 = vmatpush1.bf16.msra.mxu0 %v5874_v28  ;;  %v5943_v28 = vld [vmem:[%s8243_s1 + $0xf18] ss:$40 sps:$4 sm:$0xff]  }
 0x170   :  { %3633 = vmatpush1.bf16.msra.mxu1 %v5871_v27  ;;  %3482 = vmatprep.subr.bf16.mxu0 %v5882_v30  ;;  %v5937_v27 = vld [vmem:[%s8243_s1 + $0x200] ss:$40 sps:$4 sm:$0xff]  }
 0x171   :  { %3634 = vmatprep.subr.bf16.mxu1 %v5879_v29 }
 0x173   :  { %3483 = vmatpush1.bf16.msra.mxu0 %v5880_v32 }
 0x174   :  { %3635 = vmatpush1.bf16.msra.mxu1 %v5877_v31  ;;  %3484 = vmatprep.subr.bf16.mxu0 %v5888_v34  ;;  %v5942_v31 = vld [vmem:[%s8243_s1 + $0x254] ss:$40 sps:$4 sm:$0xff]   ;;  %v5948_v34 = vld [vmem:[%s8243_s1 + $0x2a4] ss:$40 sps:$4 sm:$0xff]  }
 0x175   :  { %3636 = vmatprep.subr.bf16.mxu1 %v5885_v33  ;;  %v5954_v33 = vld [vmem:[%s8243_s1 + $0xf24] ss:$40 sps:$4 sm:$0xff]  }
 0x177   :  { %3485 = vmatpush1.bf16.msra.mxu0 %v5886_v37  ;;  %v3894_v37 = vld [vmem:[%s8245_s3 + $0x80] sm:$0xff] }
 0x178   :  { %3637 = vmatpush1.bf16.msra.mxu1 %v5883_v36  ;;  %3486 = vmatprep.subr.bf16.mxu0 %v5894_v39  ;;  %v5951_v36 = vld [vmem:[%s8243_s1 + $0x2f4] ss:$40 sps:$4 sm:$0xff]   ;;  %v5949_v39 = vld [vmem:[%s8243_s1 + $0x2f0] ss:$40 sps:$4 sm:$0xff]  }
 0x179   :  { %3638 = vmatprep.subr.bf16.mxu1 %v5891_v38  ;;  %v3895_v38 = vld [vmem:[%s8245_s3 + $0x88] sm:$0xff] }
 0x17b   :  { %3487 = vmatpush1.bf16.msra.mxu0 %v5892_v41  ;;  %v5957_v41 = vld [vmem:[%s8243_s1 + $0x344] ss:$40 sps:$4 sm:$0xff]  }
 0x17c   :  { %3639 = vmatpush1.bf16.msra.mxu1 %v5889_v40  ;;  %3488 = vmatprep.subr.bf16.mxu0 %v5900_v43  ;;  %v5952_v40 = vld [vmem:[%s8243_s1 + $0xf20] ss:$40 sps:$4 sm:$0xff]   ;;  %v5101_v43 = vpack.c.bf16 %v3895_v38, %v3894_v37  ;;  %v5970_v38 = vld [vmem:[%s8243_s1 + $0x4d0] ss:$40 sps:$4 sm:$0xff]  }
 0x17d   :  { %3640 = vmatprep.subr.bf16.mxu1 %v5897_v42 }
 0x17f   :  { %3489 = vmatpush1.bf16.msra.mxu0 %v5898_v45 }
 0x180   :  { %3641 = vmatpush1.bf16.msra.mxu1 %v5895_v44  ;;  %3704 = vmatprep.subr.bf16.mxu0 %v5906_v48  ;;  %v6074_v44 = vld [vmem:[%s8242_s0 + $0x18] ss:$0 sps:$4 sm:$0xff]   ;;  %v5955_v48 = vld [vmem:[%s8243_s1 + $0x340] ss:$40 sps:$4 sm:$0xff]  }
 0x181   :  { %3642 = vmatprep.subr.bf16.mxu1 %v5903_v46 }
 0x182   :  { %3491 = vmatmul.mubr.bf16.vlgmr.msra.gmra.mrb[4].mxu0 %v6759_v23 }
 0x183   :  { %3705 = vmatpush1.bf16.msra.mxu0 %v5904_v51  ;;  %3736 = vmatprep.mubr.bf16.mxu0 %v6286_v52  ;;  %v5924_v52 = vld [vmem:[%s8243_s1 + $0x114] ss:$40 sps:$4 sm:$0xff]   ;;  %v3878_v51 = vld [vmem:[%s8245_s3] sm:$0xff] }
 0x184   :  { %3643 = vmatpush1.bf16.msra.mxu1 %v5901_v50  ;;  %3706 = vmatprep.subr.bf16.mxu0 %v5912_v54  ;;  %v5960_v54 = vld [vmem:[%s8243_s1 + $0x394] ss:$40 sps:$4 sm:$0xff]  }
 0x185   :  { %3644 = vmatprep.subr.bf16.mxu1 %v5909_v53  ;;  %v3879_v53 = vld [vmem:[%s8245_s3 + $0x8] sm:$0xff] }
 0x187   :  { %3707 = vmatpush1.bf16.msra.mxu0 %v5910_v56  ;;  %v5103_v56 = vpack.c.bf16 %v3879_v53, %v3878_v51  ;;  %v3890_v53 = vld [vmem:[%s8245_s3 + $0x60] sm:$0xff] }
 0x188   :  { %3645 = vmatpush1.bf16.msra.mxu1 %v5907_v55  ;;  %3708 = vmatprep.subr.bf16.mxu0 %v5918_v58  ;;  %v3896_v55 = vld [vmem:[%s8245_s3 + $0x90] sm:$0xff] }
 0x189   :  { %3646 = vmatprep.subr.bf16.mxu1 %v5915_v57  ;;  %v5958_v57 = vld [vmem:[%s8243_s1 + $0x390] ss:$40 sps:$4 sm:$0xff]  }
 0x18b   :  { %3709 = vmatpush1.bf16.msra.mxu0 %v5916_v61 }
 0x18c   :  { %3647 = vmatpush1.bf16.msra.mxu1 %v5913_v60  ;;  %3710 = vmatprep.subr.bf16.mxu0 %v5924_v52  ;;  %v3881_v60 = vld [vmem:[%s8245_s3 + $0x18] sm:$0xff]  ;;  %v3898_v52 = vld [vmem:[%s8245_s3 + $0xa0] sm:$0xff] }
 0x18d   :  { %3648 = vmatprep.subr.bf16.mxu1 %v5921_v62  ;;  %v5963_v62 = vld [vmem:[%s8243_s1 + $0x3e4] ss:$40 sps:$4 sm:$0xff]  }
 0x18f   :  { %3711 = vmatpush1.bf16.msra.mxu0 %v5922_v1 }
 0x190   :  { %3649 = vmatpush1.bf16.msra.mxu1 %v5919_v0  ;;  %3712 = vmatprep.subr.bf16.mxu0 %v5930_v4  ;;  %v3899_v0 = vld [vmem:[%s8245_s3 + $0xa8] sm:$0xff]  ;;  %v5107_v4 = vpack.c.bf16 %v3881_v60, %v3880_v59  ;;  %v5976_v59 = vld [vmem:[%s8243_s1 + $0x570] ss:$40 sps:$4 sm:$0xff]  }
 0x191   :  { %3650 = vmatprep.subr.bf16.mxu1 %v5927_v3 }
 0x193   :  { %3713 = vmatpush1.bf16.msra.mxu0 %v5928_v7  ;;  %v5961_v7 = vld [vmem:[%s8243_s1 + $0x3e0] ss:$40 sps:$4 sm:$0xff]  }
 0x194   :  { %3651 = vmatpush1.bf16.msra.mxu1 %v5925_v6  ;;  %3714 = vmatprep.subr.bf16.mxu0 %v5936_v12  ;;  %v3882_v12 = vld [vmem:[%s8245_s3 + $0x20] sm:$0xff] }
 0x195   :  { %3652 = vmatprep.subr.bf16.mxu1 %v5933_v11  ;;  %v3164_v22 = vpop.f32.mrb[0].mxu0  ;;  %v5109_v11 = vpack.c.bf16 %v3899_v0, %v3898_v52  ;;  %v3926_v0 = vld [vmem:[%s8245_s3 + $0x180] sm:$0xff] }
 0x196   :  { %v5261_v24 = vadd.f32 %v3164_v22, %v523_v13  ;;  %v3166_v25 = vpop.f32.mrb[1].mxu0  ;;  %v3883_v13 = vld [vmem:[%s8245_s3 + $0x28] sm:$0xff]  ;;  %v5964_v22 = vld [vmem:[%s8243_s1 + $0x430] ss:$40 sps:$4 sm:$0xff]  }
 0x197   :  { %v5263_v26 = vadd.f32 %v3166_v25, %v527_v16  ;;  %v3168_v18 = vpop.f32.mrb[2].mxu0  ;;  %3715 = vmatpush1.bf16.msra.mxu0 %v5934_v17  ;;  %v5966_v16 = vld [vmem:[%s8243_s1 + $0x434] ss:$40 sps:$4 sm:$0xff]  }
 0x198   :  { %3653 = vmatpush1.bf16.msra.mxu1 %v5931_v14  ;;  %v7438_v29 = vadd.f32 %v5261_v24, %v6836_v47  ;;  %v3169_v30 = vpop.f32.mrb[3].mxu0  ;;  %3716 = vmatprep.subr.bf16.mxu0 %v5939_v20  ;;  %v5940_v47 = vld [vmem:[%s8243_s1 + $0x250] ss:$40 sps:$4 sm:$0xff]   ;;  %v5969_v18 = vld [vmem:[%s8243_s1 + $0x484] ss:$40 sps:$4 sm:$0xff]  }
 0x199   :  { %3663 = vmatprep.subr.bf16.mxu1 %v5945_v21  ;;  %v5264_v32 = vadd.f32 %v5263_v26, %v6842_v49  ;;  %v5946_v49 = vld [vmem:[%s8243_s1 + $0x2a0] ss:$40 sps:$4 sm:$0xff]   ;;  %v3900_v17 = vld [vmem:[%s8245_s3 + $0xb0] sm:$0xff]  ;;  %v3901_v20 = vld [vmem:[%s8245_s3 + $0xb8] sm:$0xff]  ;;  %v5111_v21 = vpack.c.bf16 %v3883_v13, %v3882_v12 }
 0x19a   :  { %v5113_v24 = vpack.c.bf16 %v3901_v20, %v3900_v17  ;;  %v3884_v25 = vld [vmem:[%s8245_s3 + $0x30] sm:$0xff]  ;;  %v3885_v26 = vld [vmem:[%s8245_s3 + $0x38] sm:$0xff]  ;;  %v3910_v12 = vld [vmem:[%s8245_s3 + $0x100] sm:$0xff] }
 0x19b   :  { %3655 = vmatmul.mubr.bf16.vlgmr.msra.gmra.mrb[12].mxu1 %v6759_v23  ;;  %3717 = vmatpush1.bf16.msra.mxu0 %v5937_v27  ;;  %v3869_v61 = vmax.f32 %v5264_v32, 0.0  ;;  %v3902_v27 = vld [vmem:[%s8245_s3 + $0xc0] sm:$0xff]  ;;  %v5115_v30 = vpack.c.bf16 %v3885_v26, %v3884_v25  ;;  %v3911_v13 = vld [vmem:[%s8245_s3 + $0x108] sm:$0xff]  ;;  %v3929_v17 = vld [vmem:[%s8245_s3 + $0x198] sm:$0xff] }
 0x19c   :  { %3664 = vmatpush1.bf16.msra.mxu1 %v5943_v28  ;;  %3718 = vmatprep.subr.bf16.mxu0 %v5942_v31  ;;  %v3903_v28 = vld [vmem:[%s8245_s3 + $0xc8] sm:$0xff]  ;;  %v5135_v20 = vpack.c.bf16 %v3911_v13, %v3910_v12  ;;  %v3913_v25 = vld [vmem:[%s8245_s3 + $0x118] sm:$0xff]  ;;  %v3940_v13 = vld [vmem:[%s8245_s3 + $0x1f0] sm:$0xff] }
 0x19d   :  { %3695 = vmatprep.mubr.bf16.mxu1 %v6099_v2  ;;  %3827 = vmatprep.subr.bf16.mxu1 %v5954_v33  ;;  %v5967_v31 = vld [vmem:[%s8243_s1 + $0x480] ss:$40 sps:$4 sm:$0xff]   ;;  %v5117_v32 = vpack.c.bf16 %v3903_v28, %v3902_v27  ;;  %v6002_v12 = vld [vmem:[%s8243_s1 + $0x7f4] ss:$40 sps:$4 sm:$0xff]  }
 0x19e   :  { %v3886_v33 = vld [vmem:[%s8245_s3 + $0x40] sm:$0xff]  ;;  %v3931_v27 = vld [vmem:[%s8245_s3 + $0x1a8] sm:$0xff] }
 0x19f   :  { %3719 = vmatpush1.bf16.msra.mxu0 %v5940_v47  ;;  %v3887_v47 = vld [vmem:[%s8245_s3 + $0x48] sm:$0xff] }
 0x1a0   :  { %3720 = vmatprep.subr.bf16.mxu0 %v5948_v34  ;;  %v5972_v34 = vld [vmem:[%s8243_s1 + $0x4d4] ss:$40 sps:$4 sm:$0xff]   ;;  %v5119_v37 = vpack.c.bf16 %v3887_v47, %v3886_v33  ;;  %v3915_v33 = vld [vmem:[%s8245_s3 + $0x128] sm:$0xff] }
 0x1a1   :  { %v5990_v47 = vld [vmem:[%s8243_s1 + $0x6b4] ss:$40 sps:$4 sm:$0xff]  }
 0x1a3   :  { %3721 = vmatpush1.bf16.msra.mxu0 %v5946_v49  ;;  %v3904_v49 = vld [vmem:[%s8245_s3 + $0xd0] sm:$0xff] }
 0x1a4   :  { %3722 = vmatprep.subr.bf16.mxu0 %v5951_v36  ;;  %v3905_v36 = vld [vmem:[%s8245_s3 + $0xd8] sm:$0xff] }
 0x1a6   :  { %v7476_v42 = vpop.f32.mrb[4].mxu1 }
 0x1a7   :  { %4923 = vmatmul.mubr.msk.bf16.vlgmr.msra.gmra.mrb[12].mxu1 %vm3044_vm0, %v6074_v44  ;;  %v7482_v45 = vpop.f32.mrb[5].mxu1  ;;  %3723 = vmatpush1.bf16.msra.mxu0 %v5949_v39  ;;  %v5121_v39 = vpack.c.bf16 %v3905_v36, %v3904_v49  ;;  %v3933_v49 = vld [vmem:[%s8245_s3 + $0x1b8] sm:$0xff] }
 0x1a8   :  { %v3373_v46 = vpop.f32.mrb[6].mxu1  ;;  %3828 = vmatpush1.bf16.msra.mxu1 %v5952_v40  ;;  %3724 = vmatprep.subr.bf16.mxu0 %v5957_v41  ;;  %v3888_v40 = vld [vmem:[%s8245_s3 + $0x50] sm:$0xff]  ;;  %v3889_v41 = vld [vmem:[%s8245_s3 + $0x58] sm:$0xff] }
 0x1a9   :  { %v3374_v50 = vpop.f32.mrb[7].mxu1  ;;  %3859 = vmatprep.mubr.bf16.mxu1 %v6099_v2  ;;  %5102 = vmatprep.subr.bf16.mxu1 %v5101_v43  ;;  %v3897_v2 = vld [vmem:[%s8245_s3 + $0x98] sm:$0xff]  ;;  %v5975_v43 = vld [vmem:[%s8243_s1 + $0x524] ss:$40 sps:$4 sm:$0xff]  }
 0x1aa   :  { %v5105_v58 = vpack.c.bf16 %v3897_v2, %v3896_v55  ;;  %v3907_v46 = vld [vmem:[%s8245_s3 + $0xe8] sm:$0xff]  ;;  %v534_v55 = vsub.s32 3, %v7380_v63  ;;  %v5978_v2 = vld [vmem:[%s8243_s1 + $0x574] ss:$40 sps:$4 sm:$0xff]  }
 0x1ab   :  { %3725 = vmatpush1.bf16.msra.mxu0 %v5955_v48  ;;  %v5123_v48 = vpack.c.bf16 %v3889_v41, %v3888_v40  ;;  %v5973_v50 = vld [vmem:[%s8243_s1 + $0x520] ss:$40 sps:$4 sm:$0xff]   ;;  %v3917_v40 = vld [vmem:[%s8245_s3 + $0x138] sm:$0xff]  ;;  %v5993_v41 = vld [vmem:[%s8243_s1 + $0x704] ss:$40 sps:$4 sm:$0xff]  }
 0x1ac   :  { %3726 = vmatprep.subr.bf16.mxu0 %v5960_v54  ;;  %v3891_v54 = vld [vmem:[%s8245_s3 + $0x68] sm:$0xff]  ;;  %v535_v52 = vrot.slane %v7404_v9, %v534_v55  ;;  %v3936_v55 = vld [vmem:[%s8245_s3 + $0x1d0] sm:$0xff] }
 0x1ae   :  { %v7521_v1 = vpop.f32.mrb[8].mxu1 }
 0x1af   :  { %4924 = vmatmul.mubr.msk.bf16.vlgmr.msra.gmra.mrb[16].mxu1 %vm3044_vm0, %v6074_v44  ;;  %v7524_v3 = vpop.f32.mrb[9].mxu1  ;;  %3727 = vmatpush1.bf16.msra.mxu0 %v5958_v57  ;;  %v3906_v44 = vld [vmem:[%s8245_s3 + $0xe0] sm:$0xff]  ;;  %v3909_v57 = vld [vmem:[%s8245_s3 + $0xf8] sm:$0xff] }
 0x1b0   :  { %5104 = vmatpush3.bf16.msra.mxu1 %v5103_v56  ;;  %4109 = vmatprep.mubr.f32.mxu1 %v3869_v61  ;;  %v3537_v6 = vpop.f32.mrb[10].mxu1  ;;  %v5125_v51 = vpack.c.bf16 %v3907_v46, %v3906_v44  ;;  %v3908_v56 = vld [vmem:[%s8245_s3 + $0xf0] sm:$0xff]  ;;  %v3935_v44 = vld [vmem:[%s8245_s3 + $0x1c8] sm:$0xff] }
 0x1b1   :  { %5106 = vmatprep.subr.bf16.mxu1 %v5105_v58  ;;  %v3538_v14 = vpop.f32.mrb[11].mxu1  ;;  %3728 = vmatprep.subr.bf16.mxu0 %v5963_v62  ;;  %v5127_v58 = vpack.c.bf16 %v3891_v54, %v3890_v53  ;;  %v5129_v60 = vpack.c.bf16 %v3909_v57, %v3908_v56  ;;  %v3892_v61 = vld [vmem:[%s8245_s3 + $0x70] sm:$0xff]  ;;  %v3893_v62 = vld [vmem:[%s8245_s3 + $0x78] sm:$0xff]  ;;  %v3919_v53 = vld [vmem:[%s8245_s3 + $0x148] sm:$0xff] }
 0x1b2   :  { %v5131_v6 = vpack.c.bf16 %v3893_v62, %v3892_v61  ;;  %v5266_v14 = vadd.f32 %v7482_v45, %v535_v52  ;;  %v5982_v45 = vld [vmem:[%s8243_s1 + $0x610] ss:$40 sps:$4 sm:$0xff]   ;;  %v5996_v54 = vld [vmem:[%s8243_s1 + $0x754] ss:$40 sps:$4 sm:$0xff]   ;;  %v5999_v61 = vld [vmem:[%s8243_s1 + $0x7a4] ss:$40 sps:$4 sm:$0xff]  }
 0x1b3   :  { %3729 = vmatpush1.bf16.msra.mxu0 %v5961_v7  ;;  %v5979_v7 = vld [vmem:[%s8243_s1 + $0x5c0] ss:$40 sps:$4 sm:$0xff]   ;;  %v5994_v57 = vld [vmem:[%s8243_s1 + $0x750] ss:$40 sps:$4 sm:$0xff]  }
 0x1b4   :  { %5108 = vmatpush3.bf16.msra.mxu1 %v5107_v4  ;;  %3730 = vmatprep.subr.bf16.mxu0 %v5966_v16  ;;  %v3927_v4 = vld [vmem:[%s8245_s3 + $0x188] sm:$0xff]  ;;  %v3928_v16 = vld [vmem:[%s8245_s3 + $0x190] sm:$0xff]  ;;  %v3871_v26 = vmax.f32 %v5266_v14, 0.0  ;;  %v3938_v62 = vld [vmem:[%s8245_s3 + $0x1e0] sm:$0xff] }
 0x1b5   :  { %5110 = vmatprep.subr.bf16.mxu1 %v5109_v11  ;;  %v5133_v11 = vpack.c.bf16 %v3927_v4, %v3926_v0  ;;  %v3939_v52 = vld [vmem:[%s8245_s3 + $0x1e8] sm:$0xff]  ;;  %v530_v0 = vsub.s32 2, %v7380_v63  ;;  %v3941_v14 = vld [vmem:[%s8245_s3 + $0x1f8] sm:$0xff] }
 0x1b6   :  { %v5997_v4 = vld [vmem:[%s8243_s1 + $0x7a0] ss:$40 sps:$4 sm:$0xff]  }
 0x1b7   :  { %3731 = vmatpush1.bf16.msra.mxu0 %v5964_v22  ;;  %v5137_v22 = vpack.c.bf16 %v3929_v17, %v3928_v16  ;;  %v531_v16 = vrot.slane %v7404_v9, %v530_v0  ;;  %v6000_v17 = vld [vmem:[%s8243_s1 + $0x7f0] ss:$40 sps:$4 sm:$0xff]   ;;  %v3951_v0 = vld [vmem:[%s8245_s3 + $0x248] sm:$0xff] }
 0x1b8   :  { %5112 = vmatpush3.bf16.msra.mxu1 %v5111_v21  ;;  %3732 = vmatprep.subr.bf16.mxu0 %v5969_v18  ;;  %v3868_v21 = vmax.f32 %v7438_v29, 0.0  ;;  %v5987_v29 = vld [vmem:[%s8243_s1 + $0x664] ss:$40 sps:$4 sm:$0xff]  }
 0x1b9   :  { %5114 = vmatprep.subr.bf16.mxu1 %v5113_v24  ;;  %v3912_v24 = vld [vmem:[%s8245_s3 + $0x110] sm:$0xff]  ;;  %v3930_v18 = vld [vmem:[%s8245_s3 + $0x1a0] sm:$0xff] }
 0x1ba   :  { %v5139_v28 = vpack.c.bf16 %v3913_v25, %v3912_v24  ;;  %v3958_v24 = vld [vmem:[%s8245_s3 + $0x280] sm:$0xff]  ;;  %v3959_v25 = vld [vmem:[%s8245_s3 + $0x288] sm:$0xff] }
 0x1bb   :  { %3733 = vmatpush1.bf16.msra.mxu0 %v5967_v31  ;;  %v5141_v31 = vpack.c.bf16 %v3931_v27, %v3930_v18  ;;  %v6003_v18 = vld [vmem:[%s8243_s1 + $0x840] ss:$40 sps:$4 sm:$0xff]   ;;  %v5165_v27 = vpack.c.bf16 %v3959_v25, %v3958_v24  ;;  %v6026_v25 = vld [vmem:[%s8243_s1 + $0xa74] ss:$40 sps:$4 sm:$0xff]  }
 0x1bc   :  { %5116 = vmatpush3.bf16.msra.mxu1 %v5115_v30  ;;  %3734 = vmatprep.subr.bf16.mxu0 %v5972_v34  ;;  %v5985_v30 = vld [vmem:[%s8243_s1 + $0x660] ss:$40 sps:$4 sm:$0xff]   ;;  %v3932_v34 = vld [vmem:[%s8245_s3 + $0x1b0] sm:$0xff] }
 0x1bd   :  { %5118 = vmatprep.subr.bf16.mxu1 %v5117_v32  ;;  %v3914_v32 = vld [vmem:[%s8245_s3 + $0x120] sm:$0xff]  ;;  %v3955_v24 = vld [vmem:[%s8245_s3 + $0x268] sm:$0xff] }
 0x1be   :  { %v5143_v36 = vpack.c.bf16 %v3915_v33, %v3914_v32  ;;  %v3961_v32 = vld [vmem:[%s8245_s3 + $0x298] sm:$0xff] }
 0x1bf   :  { %3735 = vmatpush1.bf16.msra.mxu0 %v5970_v38  ;;  %v5145_v38 = vpack.c.bf16 %v3933_v49, %v3932_v34  ;;  %v6006_v34 = vld [vmem:[%s8243_s1 + $0x890] ss:$40 sps:$4 sm:$0xff]  }
 0x1c0   :  { %5120 = vmatpush3.bf16.msra.mxu1 %v5119_v37  ;;  %3745 = vmatprep.subr.bf16.mxu0 %v5975_v43  ;;  %v5988_v37 = vld [vmem:[%s8243_s1 + $0x6b0] ss:$40 sps:$4 sm:$0xff]   ;;  %v3934_v43 = vld [vmem:[%s8245_s3 + $0x1c0] sm:$0xff] }
 0x1c1   :  { %5122 = vmatprep.subr.bf16.mxu1 %v5121_v39  ;;  %v3916_v39 = vld [vmem:[%s8245_s3 + $0x130] sm:$0xff] }
 0x1c2   :  { %3737 = vmatmul.mubr.bf16.vlgmr.msra.gmra.mrb[8].mxu0 %v6344_v8  ;;  %v5981_v8 = vld [vmem:[%s8243_s1 + $0x5c4] ss:$40 sps:$4 sm:$0xff]   ;;  %v5147_v46 = vpack.c.bf16 %v3917_v40, %v3916_v39 }
 0x1c3   :  { %3746 = vmatpush1.bf16.msra.mxu0 %v5973_v50  ;;  %3777 = vmatprep.mubr.bf16.mxu0 %v6430_v35  ;;  %v5984_v35 = vld [vmem:[%s8243_s1 + $0x614] ss:$40 sps:$4 sm:$0xff]   ;;  %v5149_v50 = vpack.c.bf16 %v3935_v44, %v3934_v43  ;;  %v3962_v39 = vld [vmem:[%s8245_s3 + $0x2a0] sm:$0xff]  ;;  %v3963_v40 = vld [vmem:[%s8245_s3 + $0x2a8] sm:$0xff] }
 0x1c4   :  { %5124 = vmatpush3.bf16.msra.mxu1 %v5123_v48  ;;  %3747 = vmatprep.subr.bf16.mxu0 %v5978_v2  ;;  %v5991_v48 = vld [vmem:[%s8243_s1 + $0x700] ss:$40 sps:$4 sm:$0xff]   ;;  %v3937_v2 = vld [vmem:[%s8245_s3 + $0x1d8] sm:$0xff]  ;;  %v5173_v44 = vpack.c.bf16 %v3963_v40, %v3962_v39 }
 0x1c5   :  { %5126 = vmatprep.subr.bf16.mxu1 %v5125_v51  ;;  %v3918_v51 = vld [vmem:[%s8245_s3 + $0x140] sm:$0xff]  ;;  %v6038_v39 = vld [vmem:[%s8243_s1 + $0xbb4] ss:$40 sps:$4 sm:$0xff]   ;;  %v6036_v40 = vld [vmem:[%s8243_s1 + $0xbb0] ss:$40 sps:$4 sm:$0xff]  }
 0x1c6   :  { %v5151_v56 = vpack.c.bf16 %v3919_v53, %v3918_v51  ;;  %v6009_v43 = vld [vmem:[%s8243_s1 + $0x8e0] ss:$40 sps:$4 sm:$0xff]   ;;  %v3964_v51 = vld [vmem:[%s8245_s3 + $0x2b0] sm:$0xff]  ;;  %v3965_v53 = vld [vmem:[%s8245_s3 + $0x2b8] sm:$0xff] }
 0x1c7   :  { %3748 = vmatpush1.bf16.msra.mxu0 %v5976_v59  ;;  %v3920_v59 = vld [vmem:[%s8245_s3 + $0x150] sm:$0xff] }
 0x1c8   :  { %5128 = vmatpush3.bf16.msra.mxu1 %v5127_v58  ;;  %3749 = vmatprep.subr.bf16.mxu0 %v5981_v8  ;;  %v5153_v58 = vpack.c.bf16 %v3937_v2, %v3936_v55  ;;  %v6012_v55 = vld [vmem:[%s8243_s1 + $0x930] ss:$40 sps:$4 sm:$0xff]   ;;  %v5177_v2 = vpack.c.bf16 %v3965_v53, %v3964_v51  ;;  %v6050_v51 = vld [vmem:[%s8243_s1 + $0xcf4] ss:$40 sps:$4 sm:$0xff]  }
 0x1c9   :  { %5130 = vmatprep.subr.bf16.mxu1 %v5129_v60  ;;  %v3921_v60 = vld [vmem:[%s8245_s3 + $0x158] sm:$0xff] }
 0x1ca   :  { %v5155_v8 = vpack.c.bf16 %v3921_v60, %v3920_v59  ;;  %v3966_v59 = vld [vmem:[%s8245_s3 + $0x2c0] sm:$0xff]  ;;  %v3967_v60 = vld [vmem:[%s8245_s3 + $0x2c8] sm:$0xff]  ;;  %v6048_v53 = vld [vmem:[%s8243_s1 + $0xcf0] ss:$40 sps:$4 sm:$0xff]  }
 0x1cb   :  { %3750 = vmatpush1.bf16.msra.mxu0 %v5979_v7  ;;  %v3922_v7 = vld [vmem:[%s8245_s3 + $0x160] sm:$0xff] }
 0x1cc   :  { %5132 = vmatpush3.bf16.msra.mxu1 %v5131_v6  ;;  %3751 = vmatprep.subr.bf16.mxu0 %v5984_v35  ;;  %v5157_v6 = vpack.c.bf16 %v3939_v52, %v3938_v62  ;;  %v6015_v62 = vld [vmem:[%s8243_s1 + $0x980] ss:$40 sps:$4 sm:$0xff]   ;;  %v5181_v52 = vpack.c.bf16 %v3967_v60, %v3966_v59  ;;  %v6062_v59 = vld [vmem:[%s8243_s1 + $0xe34] ss:$40 sps:$4 sm:$0xff]   ;;  %v6060_v60 = vld [vmem:[%s8243_s1 + $0xe30] ss:$40 sps:$4 sm:$0xff]  }
 0x1cd   :  { %5134 = vmatprep.subr.bf16.mxu1 %v5133_v11  ;;  %v3923_v11 = vld [vmem:[%s8245_s3 + $0x168] sm:$0xff] }
 0x1ce   :  { %v5159_v35 = vpack.c.bf16 %v3923_v11, %v3922_v7  ;;  %v3969_v7 = vld [vmem:[%s8245_s3 + $0x2d8] sm:$0xff] }
 0x1cf   :  { %4110 = vmatmul.mubr.f32.vlgmr.msra.gmra.mrb[20].mxu1 %v3868_v21  ;;  %3752 = vmatpush1.bf16.msra.mxu0 %v5982_v45  ;;  %v3924_v21 = vld [vmem:[%s8245_s3 + $0x170] sm:$0xff]  ;;  %v3925_v45 = vld [vmem:[%s8245_s3 + $0x178] sm:$0xff] }
 0x1d0   :  { %5136 = vmatpush3.bf16.msra.mxu1 %v5135_v20  ;;  %4179 = vmatprep.mubr.f32.mxu1 %v3871_v26  ;;  %v5161_v20 = vpack.c.bf16 %v3941_v14, %v3940_v13  ;;  %v5163_v26 = vpack.c.bf16 %v3925_v45, %v3924_v21  ;;  %v3952_v14 = vld [vmem:[%s8245_s3 + $0x250] sm:$0xff]  ;;  %v6021_v45 = vld [vmem:[%s8243_s1 + $0xa20] ss:$40 sps:$4 sm:$0xff]  }
 0x1d1   :  { %5138 = vmatprep.subr.bf16.mxu1 %v5137_v22  ;;  %3753 = vmatprep.subr.bf16.mxu0 %v5987_v29  ;;  %v6005_v22 = vld [vmem:[%s8243_s1 + $0x844] ss:$40 sps:$4 sm:$0xff]   ;;  %v5265_v29 = vadd.f32 %v7476_v42, %v531_v16  ;;  %v6008_v42 = vld [vmem:[%s8243_s1 + $0x894] ss:$40 sps:$4 sm:$0xff]  }
 0x1d2   :  { %v6023_v16 = vld [vmem:[%s8243_s1 + $0xa24] ss:$40 sps:$4 sm:$0xff]  }
 0x1d3   :  { %3754 = vmatpush1.bf16.msra.mxu0 %v5985_v30  ;;  %v3943_v30 = vld [vmem:[%s8245_s3 + $0x208] sm:$0xff] }
 0x1d4   :  { %5140 = vmatpush3.bf16.msra.mxu1 %v5139_v28  ;;  %3755 = vmatprep.subr.bf16.mxu0 %v5990_v47  ;;  %v3942_v28 = vld [vmem:[%s8245_s3 + $0x200] sm:$0xff]  ;;  %v3870_v47 = vmax.f32 %v5265_v29, 0.0  ;;  %v3972_v29 = vld [vmem:[%s8245_s3 + $0x2f0] sm:$0xff] }
 0x1d5   :  { %5142 = vmatprep.subr.bf16.mxu1 %v5141_v31  ;;  %v3960_v31 = vld [vmem:[%s8245_s3 + $0x290] sm:$0xff]  ;;  %v5167_v33 = vpack.c.bf16 %v3943_v30, %v3942_v28 }
 0x1d6   :  { %v5169_v49 = vpack.c.bf16 %v3961_v32, %v3960_v31  ;;  %v6024_v28 = vld [vmem:[%s8243_s1 + $0xa70] ss:$40 sps:$4 sm:$0xff]   ;;  %v3990_v32 = vld [vmem:[%s8245_s3 + $0x380] sm:$0xff] }
 0x1d7   :  { %3756 = vmatpush1.bf16.msra.mxu0 %v5988_v37  ;;  %v3945_v37 = vld [vmem:[%s8245_s3 + $0x218] sm:$0xff] }
 0x1d8   :  { %5144 = vmatpush3.bf16.msra.mxu1 %v5143_v36  ;;  %3757 = vmatprep.subr.bf16.mxu0 %v5993_v41  ;;  %v3944_v36 = vld [vmem:[%s8245_s3 + $0x210] sm:$0xff]  ;;  %v3957_v31 = vld [vmem:[%s8245_s3 + $0x278] sm:$0xff] }
 0x1d9   :  { %5146 = vmatprep.subr.bf16.mxu1 %v5145_v38  ;;  %v6011_v38 = vld [vmem:[%s8243_s1 + $0x8e4] ss:$40 sps:$4 sm:$0xff]   ;;  %v5171_v41 = vpack.c.bf16 %v3945_v37, %v3944_v36  ;;  %v6030_v36 = vld [vmem:[%s8243_s1 + $0xb10] ss:$40 sps:$4 sm:$0xff]  }
 0x1da   :  { %v6035_v37 = vld [vmem:[%s8243_s1 + $0xb64] ss:$40 sps:$4 sm:$0xff]  }
 0x1db   :  { %3758 = vmatpush1.bf16.msra.mxu0 %v5991_v48  ;;  %v3947_v48 = vld [vmem:[%s8245_s3 + $0x228] sm:$0xff] }
 0x1dc   :  { %5148 = vmatpush3.bf16.msra.mxu1 %v5147_v46  ;;  %3759 = vmatprep.subr.bf16.mxu0 %v5996_v54  ;;  %v3946_v46 = vld [vmem:[%s8245_s3 + $0x220] sm:$0xff] }
 0x1dd   :  { %5150 = vmatprep.subr.bf16.mxu1 %v5149_v50  ;;  %v6014_v50 = vld [vmem:[%s8243_s1 + $0x934] ss:$40 sps:$4 sm:$0xff]   ;;  %v5175_v54 = vpack.c.bf16 %v3947_v48, %v3946_v46  ;;  %v6042_v46 = vld [vmem:[%s8243_s1 + $0xc50] ss:$40 sps:$4 sm:$0xff]   ;;  %v6047_v48 = vld [vmem:[%s8243_s1 + $0xca4] ss:$40 sps:$4 sm:$0xff]  }
 0x1df   :  { %3760 = vmatpush1.bf16.msra.mxu0 %v5994_v57  ;;  %v3949_v57 = vld [vmem:[%s8245_s3 + $0x238] sm:$0xff] }
 0x1e0   :  { %5152 = vmatpush3.bf16.msra.mxu1 %v5151_v56  ;;  %3761 = vmatprep.subr.bf16.mxu0 %v5999_v61  ;;  %v3948_v56 = vld [vmem:[%s8245_s3 + $0x230] sm:$0xff] }
 0x1e1   :  { %5154 = vmatprep.subr.bf16.mxu1 %v5153_v58  ;;  %v6017_v58 = vld [vmem:[%s8243_s1 + $0x984] ss:$40 sps:$4 sm:$0xff]   ;;  %v5179_v61 = vpack.c.bf16 %v3949_v57, %v3948_v56  ;;  %v6054_v56 = vld [vmem:[%s8243_s1 + $0xd90] ss:$40 sps:$4 sm:$0xff]  }
 0x1e2   :  { %v6059_v57 = vld [vmem:[%s8243_s1 + $0xde4] ss:$40 sps:$4 sm:$0xff]  }
 0x1e3   :  { %3762 = vmatpush1.bf16.msra.mxu0 %v5997_v4  ;;  %v6020_v4 = vld [vmem:[%s8243_s1 + $0x9d4] ss:$40 sps:$4 sm:$0xff]  }
 0x1e4   :  { %5156 = vmatpush3.bf16.msra.mxu1 %v5155_v8  ;;  %3763 = vmatprep.subr.bf16.mxu0 %v6002_v12  ;;  %v3950_v8 = vld [vmem:[%s8245_s3 + $0x240] sm:$0xff]  ;;  %v6018_v12 = vld [vmem:[%s8243_s1 + $0x9d0] ss:$40 sps:$4 sm:$0xff]  }
 0x1e5   :  { %5158 = vmatprep.subr.bf16.mxu1 %v5157_v6  ;;  %v3968_v6 = vld [vmem:[%s8245_s3 + $0x2d0] sm:$0xff]  ;;  %v5183_v11 = vpack.c.bf16 %v3951_v0, %v3950_v8  ;;  %v538_v0 = vsub.s32 4, %v7380_v63 }
 0x1e6   :  { %v5185_v13 = vpack.c.bf16 %v3969_v7, %v3968_v6  ;;  %v6066_v8 = vld [vmem:[%s8243_s1 + $0xed0] ss:$40 sps:$4 sm:$0xff]  }
 0x1e7   :  { %3764 = vmatpush1.bf16.msra.mxu0 %v6000_v17  ;;  %v3970_v17 = vld [vmem:[%s8245_s3 + $0x2e0] sm:$0xff]  ;;  %v539_v6 = vrot.slane %v7404_v9, %v538_v0 }
 0x1e8   :  { %5160 = vmatpush3.bf16.msra.mxu1 %v5159_v35  ;;  %3765 = vmatprep.subr.bf16.mxu0 %v6005_v22  ;;  %v3953_v35 = vld [vmem:[%s8245_s3 + $0x258] sm:$0xff]  ;;  %v3954_v22 = vld [vmem:[%s8245_s3 + $0x260] sm:$0xff] }
 0x1e9   :  { %5162 = vmatprep.subr.bf16.mxu1 %v5161_v20  ;;  %v3971_v20 = vld [vmem:[%s8245_s3 + $0x2e8] sm:$0xff]  ;;  %v5187_v21 = vpack.c.bf16 %v3953_v35, %v3952_v14  ;;  %v4022_v0 = vld [vmem:[%s8245_s3 + $0x480] sm:$0xff] }
 0x1eb   :  { %3766 = vmatpush1.bf16.msra.mxu0 %v6003_v18  ;;  %v3973_v18 = vld [vmem:[%s8245_s3 + $0x2f8] sm:$0xff] }
 0x1ec   :  { %5164 = vmatpush3.bf16.msra.mxu1 %v5163_v26  ;;  %3767 = vmatprep.subr.bf16.mxu0 %v6008_v42  ;;  %v5189_v26 = vpack.c.bf16 %v3971_v20, %v3970_v17  ;;  %v5193_v30 = vpack.c.bf16 %v3973_v18, %v3972_v29  ;;  %v3956_v42 = vld [vmem:[%s8245_s3 + $0x270] sm:$0xff]  ;;  %v3975_v20 = vld [vmem:[%s8245_s3 + $0x308] sm:$0xff]  ;;  %v3994_v18 = vld [vmem:[%s8245_s3 + $0x3a0] sm:$0xff] }
 0x1ed   :  { %5166 = vmatprep.subr.bf16.mxu1 %v5165_v27  ;;  %v5191_v27 = vpack.c.bf16 %v3955_v24, %v3954_v22  ;;  %v3993_v22 = vld [vmem:[%s8245_s3 + $0x398] sm:$0xff]  ;;  %v3976_v29 = vld [vmem:[%s8245_s3 + $0x310] sm:$0xff] }
 0x1ef   :  { %4180 = vmatmul.mubr.f32.vlgmr.msra.gmra.mrb[22].mxu1 %v3870_v47  ;;  %3768 = vmatpush1.bf16.msra.mxu0 %v6006_v34  ;;  %v6027_v47 = vld [vmem:[%s8243_s1 + $0xac0] ss:$40 sps:$4 sm:$0xff]  }
 0x1f0   :  { %5168 = vmatpush3.bf16.msra.mxu1 %v5167_v33  ;;  %3769 = vmatprep.subr.bf16.mxu0 %v6011_v38  ;;  %v5195_v33 = vpack.c.bf16 %v3957_v31, %v3956_v42  ;;  %v6033_v38 = vld [vmem:[%s8243_s1 + $0xb60] ss:$40 sps:$4 sm:$0xff]  }
 0x1f1   :  { %5170 = vmatprep.subr.bf16.mxu1 %v5169_v49  ;;  %v6032_v49 = vld [vmem:[%s8243_s1 + $0xb14] ss:$40 sps:$4 sm:$0xff]   ;;  %v3978_v42 = vld [vmem:[%s8245_s3 + $0x320] sm:$0xff]  ;;  %v3979_v31 = vld [vmem:[%s8245_s3 + $0x328] sm:$0xff] }
 0x1f3   :  { %3770 = vmatpush1.bf16.msra.mxu0 %v6009_v43  ;;  %v6039_v43 = vld [vmem:[%s8243_s1 + $0xc00] ss:$40 sps:$4 sm:$0xff]  }
 0x1f4   :  { %5172 = vmatpush3.bf16.msra.mxu1 %v5171_v41  ;;  %3771 = vmatprep.subr.bf16.mxu0 %v6014_v50  ;;  %v6041_v41 = vld [vmem:[%s8243_s1 + $0xc04] ss:$40 sps:$4 sm:$0xff]   ;;  %v6045_v50 = vld [vmem:[%s8243_s1 + $0xca0] ss:$40 sps:$4 sm:$0xff]  }
 0x1f5   :  { %5174 = vmatprep.subr.bf16.mxu1 %v5173_v44  ;;  %v6044_v44 = vld [vmem:[%s8243_s1 + $0xc54] ss:$40 sps:$4 sm:$0xff]  }
 0x1f7   :  { %3772 = vmatpush1.bf16.msra.mxu0 %v6012_v55  ;;  %v6051_v55 = vld [vmem:[%s8243_s1 + $0xd40] ss:$40 sps:$4 sm:$0xff]  }
 0x1f8   :  { %5176 = vmatpush3.bf16.msra.mxu1 %v5175_v54  ;;  %3773 = vmatprep.subr.bf16.mxu0 %v6017_v58  ;;  %v6053_v54 = vld [vmem:[%s8243_s1 + $0xd44] ss:$40 sps:$4 sm:$0xff]   ;;  %v6057_v58 = vld [vmem:[%s8243_s1 + $0xde0] ss:$40 sps:$4 sm:$0xff]  }
 0x1f9   :  { %5178 = vmatprep.subr.bf16.mxu1 %v5177_v2  ;;  %v6056_v2 = vld [vmem:[%s8243_s1 + $0xd94] ss:$40 sps:$4 sm:$0xff]  }
 0x1fb   :  { %3774 = vmatpush1.bf16.msra.mxu0 %v6015_v62  ;;  %v6063_v62 = vld [vmem:[%s8243_s1 + $0xe80] ss:$40 sps:$4 sm:$0xff]  }
 0x1fc   :  { %5180 = vmatpush3.bf16.msra.mxu1 %v5179_v61  ;;  %3775 = vmatprep.subr.bf16.mxu0 %v6020_v4  ;;  %v6065_v61 = vld [vmem:[%s8243_s1 + $0xe84] ss:$40 sps:$4 sm:$0xff]   ;;  %v542_v4 = vsub.s32 5, %v7380_v63 }
 0x1fd   :  { %5182 = vmatprep.subr.bf16.mxu1 %v5181_v52  ;;  %v6068_v52 = vld [vmem:[%s8243_s1 + $0xed4] ss:$40 sps:$4 sm:$0xff]  }
 0x1fe   :  { %v543_v7 = vrot.slane %v7404_v9, %v542_v4  ;;  %v4023_v4 = vld [vmem:[%s8245_s3 + $0x488] sm:$0xff] }
 0x1ff   :  { %3776 = vmatpush1.bf16.msra.mxu0 %v6018_v12 }
 0x200   :  { %5184 = vmatpush3.bf16.msra.mxu1 %v5183_v11  ;;  %3786 = vmatprep.subr.bf16.mxu0 %v6023_v16 }
 0x201   :  { %5186 = vmatprep.subr.bf16.mxu1 %v5185_v13 }
 0x202   :  { %3778 = vmatmul.mubr.bf16.vlgmr.msra.gmra.mrb[8].mxu0 %v6556_v15  ;;  %v6029_v15 = vld [vmem:[%s8243_s1 + $0xac4] ss:$40 sps:$4 sm:$0xff]  }
 0x203   :  { %3787 = vmatpush1.bf16.msra.mxu0 %v6021_v45  ;;  %3818 = vmatprep.mubr.bf16.mxu0 %v6571_v19  ;;  %v3991_v19 = vld [vmem:[%s8245_s3 + $0x388] sm:$0xff]  ;;  %v3992_v45 = vld [vmem:[%s8245_s3 + $0x390] sm:$0xff] }
 0x204   :  { %5188 = vmatpush3.bf16.msra.mxu1 %v5187_v21  ;;  %3788 = vmatprep.subr.bf16.mxu0 %v6026_v25  ;;  %v5197_v34 = vpack.c.bf16 %v3991_v19, %v3990_v32  ;;  %v3997_v32 = vld [vmem:[%s8245_s3 + $0x3b8] sm:$0xff]  ;;  %v5207_v19 = vpack.c.bf16 %v3979_v31, %v3978_v42  ;;  %v4010_v31 = vld [vmem:[%s8245_s3 + $0x420] sm:$0xff] }
 0x205   :  { %5190 = vmatprep.subr.bf16.mxu1 %v5189_v26  ;;  %v5201_v26 = vpack.c.bf16 %v3993_v22, %v3992_v45 }
 0x207   :  { %3789 = vmatpush1.bf16.msra.mxu0 %v6024_v28 }
 0x208   :  { %5192 = vmatpush3.bf16.msra.mxu1 %v5191_v27  ;;  %3790 = vmatprep.subr.bf16.mxu0 %v6029_v15  ;;  %v3995_v27 = vld [vmem:[%s8245_s3 + $0x3a8] sm:$0xff]  ;;  %v3996_v15 = vld [vmem:[%s8245_s3 + $0x3b0] sm:$0xff] }
 0x209   :  { %5194 = vmatprep.subr.bf16.mxu1 %v5193_v30  ;;  %v5205_v30 = vpack.c.bf16 %v3995_v27, %v3994_v18  ;;  %v4027_v18 = vld [vmem:[%s8245_s3 + $0x4a8] sm:$0xff] }
 0x20b   :  { %3791 = vmatpush1.bf16.msra.mxu0 %v6027_v47  ;;  %v3980_v47 = vld [vmem:[%s8245_s3 + $0x330] sm:$0xff] }
 0x20c   :  { %5196 = vmatpush3.bf16.msra.mxu1 %v5195_v33  ;;  %3792 = vmatprep.subr.bf16.mxu0 %v6032_v49  ;;  %v5209_v33 = vpack.c.bf16 %v3997_v32, %v3996_v15  ;;  %v3998_v49 = vld [vmem:[%s8245_s3 + $0x3c0] sm:$0xff]  ;;  %v4011_v15 = vld [vmem:[%s8245_s3 + $0x428] sm:$0xff] }
 0x20d   :  { %5198 = vmatprep.subr.bf16.mxu1 %v5197_v34  ;;  %v3981_v34 = vld [vmem:[%s8245_s3 + $0x338] sm:$0xff] }
 0x20f   :  { %3793 = vmatpush1.bf16.msra.mxu0 %v6030_v36  ;;  %v3999_v36 = vld [vmem:[%s8245_s3 + $0x3c8] sm:$0xff] }
 0x210   :  { %3794 = vmatprep.subr.bf16.mxu0 %v6035_v37  ;;  %v5211_v37 = vpack.c.bf16 %v3981_v34, %v3980_v47  ;;  %v5239_v34 = vpack.c.bf16 %v4011_v15, %v4010_v31 }
 0x213   :  { %3795 = vmatpush1.bf16.msra.mxu0 %v6033_v38  ;;  %v5213_v38 = vpack.c.bf16 %v3999_v36, %v3998_v49  ;;  %v4012_v36 = vld [vmem:[%s8245_s3 + $0x430] sm:$0xff] }
 0x214   :  { %3796 = vmatprep.subr.bf16.mxu0 %v6038_v39  ;;  %v3982_v39 = vld [vmem:[%s8245_s3 + $0x340] sm:$0xff] }
 0x217   :  { %3797 = vmatpush1.bf16.msra.mxu0 %v6036_v40  ;;  %v3983_v40 = vld [vmem:[%s8245_s3 + $0x348] sm:$0xff] }
 0x218   :  { %3798 = vmatprep.subr.bf16.mxu0 %v6041_v41  ;;  %v4000_v41 = vld [vmem:[%s8245_s3 + $0x3d0] sm:$0xff] }
 0x21b   :  { %3799 = vmatpush1.bf16.msra.mxu0 %v6039_v43  ;;  %v4001_v43 = vld [vmem:[%s8245_s3 + $0x3d8] sm:$0xff] }
 0x21c   :  { %3800 = vmatprep.subr.bf16.mxu0 %v6044_v44  ;;  %v5215_v44 = vpack.c.bf16 %v3983_v40, %v3982_v39  ;;  %v4031_v39 = vld [vmem:[%s8245_s3 + $0x4c8] sm:$0xff] }
 0x21f   :  { %3801 = vmatpush1.bf16.msra.mxu0 %v6042_v46  ;;  %v5217_v46 = vpack.c.bf16 %v4001_v43, %v4000_v41  ;;  %v4014_v43 = vld [vmem:[%s8245_s3 + $0x440] sm:$0xff] }
 0x220   :  { %3802 = vmatprep.subr.bf16.mxu0 %v6047_v48  ;;  %v3984_v48 = vld [vmem:[%s8245_s3 + $0x350] sm:$0xff] }
 0x223   :  { %3803 = vmatpush1.bf16.msra.mxu0 %v6045_v50  ;;  %v3985_v50 = vld [vmem:[%s8245_s3 + $0x358] sm:$0xff] }
 0x224   :  { %3804 = vmatprep.subr.bf16.mxu0 %v6050_v51  ;;  %v4002_v51 = vld [vmem:[%s8245_s3 + $0x3e0] sm:$0xff] }
 0x227   :  { %3805 = vmatpush1.bf16.msra.mxu0 %v6048_v53  ;;  %v4003_v53 = vld [vmem:[%s8245_s3 + $0x3e8] sm:$0xff] }
 0x228   :  { %3806 = vmatprep.subr.bf16.mxu0 %v6053_v54  ;;  %v5219_v54 = vpack.c.bf16 %v3985_v50, %v3984_v48  ;;  %v4033_v48 = vld [vmem:[%s8245_s3 + $0x4d8] sm:$0xff] }
 0x22b   :  { %3807 = vmatpush1.bf16.msra.mxu0 %v6051_v55  ;;  %v5221_v55 = vpack.c.bf16 %v4003_v53, %v4002_v51  ;;  %v4016_v53 = vld [vmem:[%s8245_s3 + $0x450] sm:$0xff] }
 0x22c   :  { %3808 = vmatprep.subr.bf16.mxu0 %v6056_v2  ;;  %v3986_v2 = vld [vmem:[%s8245_s3 + $0x360] sm:$0xff] }
 0x22f   :  { %3809 = vmatpush1.bf16.msra.mxu0 %v6054_v56  ;;  %v3987_v56 = vld [vmem:[%s8245_s3 + $0x368] sm:$0xff] }
 0x230   :  { %3810 = vmatprep.subr.bf16.mxu0 %v6059_v57  ;;  %v4004_v57 = vld [vmem:[%s8245_s3 + $0x3f0] sm:$0xff] }
 0x233   :  { %3811 = vmatpush1.bf16.msra.mxu0 %v6057_v58  ;;  %v4005_v58 = vld [vmem:[%s8245_s3 + $0x3f8] sm:$0xff] }
 0x234   :  { %3812 = vmatprep.subr.bf16.mxu0 %v6062_v59  ;;  %v546_v59 = vsub.s32 6, %v7380_v63 }
 0x237   :  { %3813 = vmatpush1.bf16.msra.mxu0 %v6060_v60  ;;  %v5223_v60 = vpack.c.bf16 %v3987_v56, %v3986_v2  ;;  %v4034_v2 = vld [vmem:[%s8245_s3 + $0x4e0] sm:$0xff]  ;;  %v4035_v56 = vld [vmem:[%s8245_s3 + $0x4e8] sm:$0xff] }
 0x238   :  { %3814 = vmatprep.subr.bf16.mxu0 %v6065_v61  ;;  %v550_v61 = vsub.s32 7, %v7380_v63 }
 0x23b   :  { %3815 = vmatpush1.bf16.msra.mxu0 %v6063_v62  ;;  %v5225_v62 = vpack.c.bf16 %v4005_v58, %v4004_v57  ;;  %v5253_v57 = vpack.c.bf16 %v4035_v56, %v4034_v2  ;;  %v4018_v58 = vld [vmem:[%s8245_s3 + $0x460] sm:$0xff] }
 0x23c   :  { %3816 = vmatprep.subr.bf16.mxu0 %v6068_v52  ;;  %v3988_v52 = vld [vmem:[%s8245_s3 + $0x370] sm:$0xff] }
 0x23f   :  { %3817 = vmatpush1.bf16.msra.mxu0 %v6066_v8  ;;  %v3989_v8 = vld [vmem:[%s8245_s3 + $0x378] sm:$0xff] }
 0x242   :  { %3819 = vmatmul.mubr.bf16.vlgmr.msra.gmra.mrb[8].mxu0 %v6759_v23  ;;  %v3974_v23 = vld [vmem:[%s8245_s3 + $0x300] sm:$0xff] }
 0x243   :  { %v5199_v24 = vpack.c.bf16 %v3975_v20, %v3974_v23 }
 0x255   :  { %v3492_v11 = vpop.f32.mrb[4].mxu0 }
 0x256   :  { %v5267_v12 = vadd.f32 %v3492_v11, %v539_v6  ;;  %v3494_v13 = vpop.f32.mrb[5].mxu0  ;;  %v547_v6 = vrot.slane %v7404_v9, %v546_v59  ;;  %v5227_v11 = vpack.c.bf16 %v3989_v8, %v3988_v52  ;;  %v4019_v59 = vld [vmem:[%s8245_s3 + $0x468] sm:$0xff]  ;;  %v4020_v8 = vld [vmem:[%s8245_s3 + $0x470] sm:$0xff] }
 0x257   :  { %v5269_v14 = vadd.f32 %v3494_v13, %v543_v7  ;;  %v3496_v35 = vpop.f32.mrb[6].mxu0  ;;  %v551_v7 = vrot.slane %v7404_v9, %v550_v61  ;;  %v4024_v9 = vld [vmem:[%s8245_s3 + $0x490] sm:$0xff] }
 0x258   :  { %v5268_v16 = vadd.f32 %v5267_v12, %v7521_v1  ;;  %v3497_v17 = vpop.f32.mrb[7].mxu0  ;;  %v5229_v12 = vpack.c.bf16 %v4023_v4, %v4022_v0  ;;  %v4036_v61 = vld [vmem:[%s8245_s3 + $0x4f0] sm:$0xff]  ;;  %v4021_v0 = vld [vmem:[%s8245_s3 + $0x478] sm:$0xff] }
 0x259   :  { %v5270_v21 = vadd.f32 %v5269_v14, %v7524_v3  ;;  %v3977_v3 = vld [vmem:[%s8245_s3 + $0x318] sm:$0xff]  ;;  %v4007_v17 = vld [vmem:[%s8245_s3 + $0x408] sm:$0xff]  ;;  %v5259_v4 = vpack.c.bf16 %v4021_v0, %v4020_v8 }
 0x25a   :  { %v3872_v25 = vmax.f32 %v5268_v16, 0.0  ;;  %v5203_v28 = vpack.c.bf16 %v3977_v3, %v3976_v29  ;;  %v4006_v16 = vld [vmem:[%s8245_s3 + $0x400] sm:$0xff]  ;;  %v4009_v29 = vld [vmem:[%s8245_s3 + $0x418] sm:$0xff] }
 0x25b   :  { %v3873_v1 = vmax.f32 %v5270_v21, 0.0  ;;  %v4025_v21 = vld [vmem:[%s8245_s3 + $0x498] sm:$0xff]  ;;  %v4026_v3 = vld [vmem:[%s8245_s3 + $0x4a0] sm:$0xff] }
 0x25c   :  { %v5237_v42 = vpack.c.bf16 %v4027_v18, %v4026_v3 }
 0x25d   :  { %4249 = vmatprep.mubr.f32.mxu1 %v3873_v1  ;;  %v5231_v1 = vpack.c.bf16 %v4007_v17, %v4006_v16 }
 0x25e   :  { %4250 = vmatmul.mubr.f32.vlgmr.msra.gmra.mrb[24].mxu1 %v3872_v25  ;;  %v5233_v25 = vpack.c.bf16 %v4025_v21, %v4024_v9 }
 0x25f   :  { %5200 = vmatpush3.bf16.msra.mxu1 %v5199_v24 }
 0x260   :  { %5202 = vmatprep.subr.bf16.mxu1 %v5201_v26  ;;  %v4008_v26 = vld [vmem:[%s8245_s3 + $0x410] sm:$0xff] }
 0x263   :  { %5204 = vmatpush3.bf16.msra.mxu1 %v5203_v28  ;;  %v5235_v28 = vpack.c.bf16 %v4009_v29, %v4008_v26 }
 0x264   :  { %5206 = vmatprep.subr.bf16.mxu1 %v5205_v30 }
 0x267   :  { %5208 = vmatpush3.bf16.msra.mxu1 %v5207_v19  ;;  %v4028_v19 = vld [vmem:[%s8245_s3 + $0x4b0] sm:$0xff] }
 0x268   :  { %5210 = vmatprep.subr.bf16.mxu1 %v5209_v33  ;;  %v4029_v33 = vld [vmem:[%s8245_s3 + $0x4b8] sm:$0xff] }
 0x269   :  { %v5241_v49 = vpack.c.bf16 %v4029_v33, %v4028_v19 }
 0x26b   :  { %5212 = vmatpush3.bf16.msra.mxu1 %v5211_v37  ;;  %v4013_v37 = vld [vmem:[%s8245_s3 + $0x438] sm:$0xff] }
 0x26c   :  { %5214 = vmatprep.subr.bf16.mxu1 %v5213_v38  ;;  %v4030_v38 = vld [vmem:[%s8245_s3 + $0x4c0] sm:$0xff]  ;;  %v5243_v40 = vpack.c.bf16 %v4013_v37, %v4012_v36 }
 0x26d   :  { %v5245_v41 = vpack.c.bf16 %v4031_v39, %v4030_v38 }
 0x26f   :  { %5216 = vmatpush3.bf16.msra.mxu1 %v5215_v44  ;;  %v4015_v44 = vld [vmem:[%s8245_s3 + $0x448] sm:$0xff] }
 0x270   :  { %5218 = vmatprep.subr.bf16.mxu1 %v5217_v46  ;;  %v4032_v46 = vld [vmem:[%s8245_s3 + $0x4d0] sm:$0xff]  ;;  %v5247_v50 = vpack.c.bf16 %v4015_v44, %v4014_v43 }
 0x271   :  { %v5249_v51 = vpack.c.bf16 %v4033_v48, %v4032_v46 }
 0x273   :  { %5220 = vmatpush3.bf16.msra.mxu1 %v5219_v54  ;;  %v4017_v54 = vld [vmem:[%s8245_s3 + $0x458] sm:$0xff] }
 0x274   :  { %5222 = vmatprep.subr.bf16.mxu1 %v5221_v55  ;;  %v5251_v55 = vpack.c.bf16 %v4017_v54, %v4016_v53 }
 0x277   :  { %5224 = vmatpush3.bf16.msra.mxu1 %v5223_v60  ;;  %v5255_v60 = vpack.c.bf16 %v4019_v59, %v4018_v58 }
 0x278   :  { %5226 = vmatprep.subr.bf16.mxu1 %v5225_v62  ;;  %v4037_v62 = vld [vmem:[%s8245_s3 + $0x4f8] sm:$0xff] }
 0x279   :  { %v5257_v52 = vpack.c.bf16 %v4037_v62, %v4036_v61 }
 0x27a   :  { %v3697_v13 = vpop.f32.mrb[12].mxu1 }
 0x27b   :  { %v5271_v14 = vadd.f32 %v3697_v13, %v547_v6  ;;  %v3699_v35 = vpop.f32.mrb[13].mxu1  ;;  %5228 = vmatpush3.bf16.msra.mxu1 %v5227_v11 }
 0x27c   :  { %v5272_v23 = vadd.f32 %v3699_v35, %v551_v7  ;;  %v3701_v20 = vpop.f32.mrb[14].mxu1  ;;  %5230 = vmatprep.subr.bf16.mxu1 %v5229_v12  ;;  %v4925_v12 = vld [vmem:[%s8246_s4] ss:$0 sm:$0xff] }
 0x27d   :  { %v3702_v45 = vpop.f32.mrb[15].mxu1  ;;  %v3874_v24 = vmax.f32 %v5271_v14, 0.0 }
 0x27e   :  { %v3875_v22 = vmax.f32 %v5272_v23, 0.0  ;;  %v517_v23 = vld [vmem:[%s8244_s2 + $0x8] sm:$0x3]  ;;  %s6100_s2 = smov [#allocation2]  }
 0x27f   :  { %v555_v20 = vrot.slane %v517_v23, %v522_v5  ;;  %v559_v9 = vrot.slane %v517_v23, %v526_v10  ;;  %s4415_s3 = sshll.u32 %s6100_s2, 4  ;;  %s4416_s3 = int_to_ptr.vmem [resolvable:$true] %s4415_s3 }
 0x280   :  { %4319 = vmatprep.mubr.f32.mxu1 %v3875_v22  ;;  %s6075_s4 = scalar_lea.vmem %s4416_s3, 128  ;;  %p6080_p1 = scmp.lt.s32.totalorder %s4416_s3, %s4416_s3 }
 0x281   :  { %4320 = vmatmul.mubr.f32.vlgmr.msra.gmra.mrb[26].mxu1 %v3874_v24  ;;  %p6076_p0 = scmp.ne.s32.totalorder %s4416_s3, %s6075_s4  ;;  %p6081_p2 = scmp.lt.s32.totalorder %s6075_s4, %s6075_s4 }
 0x282   :  { %v8145_v27 = vpop.f32.mrb[16].mxu1  ;;  %5232 = vmatpush3.bf16.msra.mxu1 %v5231_v1 }
 0x283   :  { %v8147_v30 = vpop.f32.mrb[17].mxu1  ;;  %5234 = vmatprep.subr.bf16.mxu1 %v5233_v25  ;;  %p6082_p3 = por %p6081_p2, %p6080_p1 }
 0x284   :  { %v3865_v32 = vpop.f32.mrb[18].mxu1 }
 0x285   :  { %v3866_v47 = vpop.f32.mrb[19].mxu1  ;;  %p6083_p4 = pnand %p6082_p3, %p6076_p0 }
 0x286   :  { %5236 = vmatpush3.bf16.msra.mxu1 %v5235_v28 }
 0x287   :  { %5238 = vmatprep.subr.bf16.mxu1 %v5237_v42 }
 0x28a   :  { %5240 = vmatpush3.bf16.msra.mxu1 %v5239_v34 }
 0x28b   :  { %5242 = vmatprep.subr.bf16.mxu1 %v5241_v49 }
 0x28e   :  { %5244 = vmatpush3.bf16.msra.mxu1 %v5243_v40 }
 0x28f   :  { %5246 = vmatprep.subr.bf16.mxu1 %v5245_v41 }
 0x292   :  { %5248 = vmatpush3.bf16.msra.mxu1 %v5247_v50 }
 0x293   :  { %5250 = vmatprep.subr.bf16.mxu1 %v5249_v51 }
 0x296   :  { %5252 = vmatpush3.bf16.msra.mxu1 %v5251_v55 }
 0x297   :  { %5254 = vmatprep.subr.bf16.mxu1 %v5253_v57 }
 0x29a   :  { %5256 = vmatpush3.bf16.msra.mxu1 %v5255_v60 }
 0x29b   :  { %5258 = vmatprep.subr.bf16.mxu1 %v5257_v52 }
 0x29e   :  { %5260 = vmatpush3.bf16.msra.mxu1 %v5259_v4 }
 0x2a2   :  { %v4958_v6 = vpop.f32.mrb[20].mxu1 }
 0x2a3   :  { %v4959_v7 = vpop.f32.mrb[21].mxu1 }
 0x2a4   :  { %v4960_v11 = vadd.f32 %v4959_v7, %v4958_v6 }
 0x2a6   :  { %v4112_v35 = vadd.f32 %v4960_v11, %v4925_v12 }
 0x2c2   :  { %v4993_v13 = vpop.f32.mrb[22].mxu1 }
 0x2c3   :  { %v4994_v14 = vpop.f32.mrb[23].mxu1 }
 0x2c4   :  { %v4995_v16 = vadd.f32 %v4994_v14, %v4993_v13 }
 0x2c6   :  { %v4182_v17 = vadd.f32 %v4995_v16, %v4112_v35 }
 0x315   :  { %v3820_v21 = vpop.f32.mrb[8].mxu0 }
 0x316   :  { %v5273_v45 = vadd.f32 %v3820_v21, %v555_v20  ;;  %v3822_v22 = vpop.f32.mrb[9].mxu0 }
 0x317   :  { %v5275_v1 = vadd.f32 %v3822_v22, %v559_v9  ;;  %v3824_v24 = vpop.f32.mrb[10].mxu0 }
 0x318   :  { %v5274_v25 = vadd.f32 %v5273_v45, %v8145_v27  ;;  %v3825_v26 = vpop.f32.mrb[11].mxu0 }
 0x319   :  { %v5276_v29 = vadd.f32 %v5275_v1, %v8147_v30 }
 0x31a   :  { %v3876_v18 = vmax.f32 %v5274_v25, 0.0 }
 0x31b   :  { %v3877_v3 = vmax.f32 %v5276_v29, 0.0 }
 0x31d   :  { %4389 = vmatprep.mubr.f32.mxu1 %v3877_v3 }
 0x31e   :  { %4390 = vmatmul.mubr.f32.vlgmr.msra.gmra.mrb[28].mxu1 %v3876_v18 }
 0x331   :  { %v5028_v28 = vpop.f32.mrb[24].mxu1 }
 0x332   :  { %v5029_v42 = vpop.f32.mrb[25].mxu1 }
 0x333   :  { %v5030_v5 = vadd.f32 %v5029_v42, %v5028_v28 }
 0x335   :  { %v4252_v31 = vadd.f32 %v5030_v5, %v4182_v17 }
 0x354   :  { %v5063_v63 = vpop.f32.mrb[26].mxu1 }
 0x355   :  { %v5064_v10 = vpop.f32.mrb[27].mxu1 }
 0x356   :  { %v5065_v15 = vadd.f32 %v5064_v10, %v5063_v63 }
 0x358   :  { %v4322_v32 = vadd.f32 %v5065_v15, %v4252_v31 }
 0x3f1   :  { %v5098_v19 = vpop.f32.mrb[28].mxu1 }
 0x3f2   :  { %v5099_v33 = vpop.f32.mrb[29].mxu1 }
 0x3f3   :  { %v5100_v47 = vadd.f32 %v5099_v33, %v5098_v19 }
 0x3f5   :  { %v4392_v27 = vadd.f32 %v5100_v47, %v4322_v32 }
 0x3f7   :  { %v4396_v34 = vsel %vm4395_vm1, %v4392_v27, -inf }
 0x3f8   :  { %4397 = vmax.xlane.f32.xlu0 %v4396_v34 }
 0x485   :  { %v4398_v30 = vpop.xlane.xlu0 %4397 }
 0x486   :  { %v4399_v49 = vsub.f32 %v4392_v27, %v4398_v30 }
 0x488   :  { %v4400_v36 = vmul.f32 1.442695, %v4399_v49 }
 0x48a   :  { %6069 = vpow2.f32 %v4400_v36 }
 0x494   :  { %v6070_v37 = vpop.eup %6069 }
 0x495   :  { %v4402_v38 = vsel %vm4395_vm1, %v6070_v37, 0.0 }
 0x496   :  { %4403 = vadd.xlane.f32.xlu0 %v4402_v38 }
 0x523   :  { %v4404_v39 = vpop.xlane.xlu0 %4403 }
 0x524   :  { %6071 = vlog2.f32 %v4404_v39 }
 0x52e   :  { %v6072_v40 = vpop.eup %6071 }
 0x52f   :  { %v4406_v41 = vmul.f32 0.6931472, %v6072_v40 }
 0x531   :  { %v4407_v43 = vsub.f32 %v4399_v49, %v4406_v41 }
 0x533   :  { %4408 = vst.msk [vmem:[#allocation2] sm:$0xff] %vm4395_vm1, %v4407_v43 }
 0x534   :  { %6086 = shalt.err (!%p6083_p4)
}
 0x535   :  { %s6087_s15 = scalar_lea.hbm %s8247_s5, 128 }
 0x536   :  { %p6088_p5 = scmp.ne.s32.totalorder %s8247_s5, %s6087_s15  ;;  %p6091_p6 = scmp.lt.u32.totalorder %s6087_s15, %s8247_s5 }
 0x538   :  { %p6093_p7 = pnand %p6091_p6, %p6088_p5 }
 0x53a   :  { %6096 = shalt.err (!%p6093_p7)
}
 0x53b   :  { %4418 = dma.vmem_to_hbm [thread:$0]  %s4416_s3, 128, %s8247_s5, [#allocation3]  }
 0x53c   :  { %6097 = dma.done.wait [#allocation3], 128  }
 0x53d   :  { %6098 = vsyncadd [#allocation3], 4294967168 }
 0x53e   :  { %4422 = vsyncpa [#allocation3], 1 }

</bundles_post_ra>
